<compile_context>
chip_gen: v7x
topology: tpu7x:2x2x1
jax: 0.10.0
libtpu: 0.0.40
codegen_flags: <defaults>
</compile_context>

<pallas_src>
import jax
import jax.numpy as jnp
from jax.experimental import pallas as pl
from jax.experimental.pallas import tpu as pltpu

LANE = 128  # TPU lane width (last-dim vector width)


def mlp_higgs_kernel(x_ref, w1_ref, b1_ref, w2_ref, b2_ref, w4_ref, b4_ref,
                     o_ref):
    # x_ref: (bm, input_dim) batch tile. Weights/biases: whole arrays in VMEM.
    x = x_ref[...]
    h1 = jnp.dot(x, w1_ref[...], preferred_element_type=jnp.float32)
    h1 = jnp.maximum(h1 + b1_ref[...], 0.0).astype(w2_ref.dtype)     # ReLU(fc1)
    h2 = jnp.dot(h1, w2_ref[...], preferred_element_type=jnp.float32)
    h2 = jnp.maximum(h2 + b2_ref[...], 0.0).astype(w4_ref.dtype)     # ReLU(fc2)
    out = jnp.dot(h2, w4_ref[...], preferred_element_type=jnp.float32)
    o_ref[...] = (out + b4_ref[...]).astype(o_ref.dtype)             # fc4 (padded lanes)


def mlp_higgs_forward(x, params, *, bm=256, compute_dtype=None):
    """Forward pass.

    x: (B, input_dim) float32.
    params: dict with w{1,2,4} of shape (in, out) (transposed vs torch.nn.Linear)
            and b{1,2,4} of shape (1, out).
    bm: batch tile (sweep 128-1024; multiple of 8, ideally 256 on v6e/v7x).
    compute_dtype: dtype fed to the MXU (e.g. jnp.bfloat16 on v6e/v7x);
                   accumulation is always f32, biases/output stay f32.
    """
    B, input_dim = x.shape
    hidden_dim = params["w1"].shape[1]
    output_dim = params["w4"].shape[1]
    out_dtype = jnp.float32
    compute_dtype = compute_dtype or x.dtype

    # Don't use a tile much bigger than the (sublane-aligned) batch itself.
    bm = min(bm, 8 * pl.cdiv(B, 8))

    # Pad batch up to a multiple of the tile (tail rows are zeros, sliced off).
    B_pad = bm * pl.cdiv(B, bm)
    if B_pad != B:
        x = jnp.pad(x, ((0, B_pad - B), (0, 0)))

    # Lane-dense output: pad the final layer's output dim up to 128 lanes.
    out_pad = LANE * pl.cdiv(output_dim, LANE)
    w4, b4 = params["w4"], params["b4"]
    if out_pad != output_dim:
        w4 = jnp.pad(w4, ((0, 0), (0, out_pad - output_dim)))
        b4 = jnp.pad(b4, ((0, 0), (0, out_pad - output_dim)))

    # Cast MXU operands; biases stay f32 (added after f32 accumulation).
    x_k = x.astype(compute_dtype)
    w1 = params["w1"].astype(compute_dtype)
    w2 = params["w2"].astype(compute_dtype)
    w4 = w4.astype(compute_dtype)
    b1 = params["b1"].astype(jnp.float32)
    b2 = params["b2"].astype(jnp.float32)
    b4 = b4.astype(jnp.float32)

    grid = (B_pad // bm,)

    # Grid-invariant operands: whole-array VMEM residents (no double-buffering).
    vmem_resident = pl.BlockSpec(memory_space=pltpu.MemorySpace.VMEM)

    itemsize = jnp.dtype(compute_dtype).itemsize
    flops = 2 * B_pad * (input_dim * hidden_dim
                         + hidden_dim * hidden_dim
                         + hidden_dim * out_pad)
    bytes_accessed = (
        B_pad * input_dim * itemsize                          # x in
        + (input_dim * hidden_dim + hidden_dim * hidden_dim
           + hidden_dim * out_pad) * itemsize                 # weights
        + (2 * hidden_dim + out_pad) * 4                      # biases (f32)
        + B_pad * out_pad * 4)                                # out

    out_padded = pl.pallas_call(
        mlp_higgs_kernel,
        out_shape=jax.ShapeDtypeStruct((B_pad, out_pad), out_dtype),
        grid_spec=pltpu.PrefetchScalarGridSpec(
            num_scalar_prefetch=0,
            grid=grid,
            in_specs=[
                pl.BlockSpec((bm, input_dim), lambda i: (i, 0)),   # x (pipelined)
                vmem_resident,                                     # w1
                vmem_resident,                                     # b1
                vmem_resident,                                     # w2
                vmem_resident,                                     # b2
                vmem_resident,                                     # w4 (lane-padded)
                vmem_resident,                                     # b4 (lane-padded)
            ],
            out_specs=pl.BlockSpec((bm, out_pad), lambda i: (i, 0)),
        ),
        compiler_params=pltpu.CompilerParams(
            dimension_semantics=("parallel",)),
        cost_estimate=pl.CostEstimate(
            flops=flops, transcendentals=0, bytes_accessed=bytes_accessed),
    )(x_k, w1, b1, w2, b2, w4, b4)

    # Strip batch padding and the lane padding of the output column.
    return out_padded[:B, :output_dim]


def init_params(key, input_dim=24, hidden_dim=256, output_dim=1):
    """Deterministic synthetic parameters (PyTorch Linear init, stored as (in, out))."""
    ks = jax.random.split(key, 6)

    def lin(kw, kb, fan_in, fan_out):
        bound = 1.0 / jnp.sqrt(fan_in)
        w = jax.random.uniform(kw, (fan_in, fan_out), jnp.float32, -bound, bound)
        b = jax.random.uniform(kb, (1, fan_out), jnp.float32, -bound, bound)
        return w, b

    w1, b1 = lin(ks[0], ks[1], input_dim, hidden_dim)
    w2, b2 = lin(ks[2], ks[3], hidden_dim, hidden_dim)
    w4, b4 = lin(ks[4], ks[5], hidden_dim, output_dim)
    return {"w1": w1, "b1": b1, "w2": w2, "b2": b2, "w4": w4, "b4": b4}


def mlp_higgs_ref(x, p):
    h1 = jnp.maximum(x @ p["w1"] + p["b1"], 0.0)
    h2 = jnp.maximum(h1 @ p["w2"] + p["b2"], 0.0)
    return h2 @ p["w4"] + p["b4"]


if __name__ == "__main__":
    key = jax.random.PRNGKey(0)
    kx, kp = jax.random.split(key)

    # Shapes implied by the module: input_dim=24, hidden=256, output=1.
    # B=300 exercises both batch padding (300 -> 512) and a multi-step grid.
    B, input_dim, hidden_dim, output_dim = 300, 24, 256, 1
    x = jax.random.normal(kx, (B, input_dim), jnp.float32)
    params = init_params(kp, input_dim, hidden_dim, output_dim)

    ref = mlp_higgs_ref(x, params)

    # f32 path (v5e-friendly).
    out_f32 = jax.block_until_ready(mlp_higgs_forward(x, params, bm=256))
    assert out_f32.shape == (B, output_dim)
    assert jnp.allclose(out_f32, ref, atol=1e-4, rtol=1e-4)

    # bf16 compute path (v6e / v7x MXU fast path), f32 accumulate.
    out_bf16 = jax.block_until_ready(
        mlp_higgs_forward(x, params, bm=256, compute_dtype=jnp.bfloat16))
    assert out_bf16.shape == (B, output_dim)
    assert jnp.allclose(out_bf16, ref, atol=5e-2, rtol=5e-2)

    print("KERNEL_OK")
</pallas_src>

<mosaic_0001>
module attributes {stable_mosaic.version = 11 : i64} {
  func.func @mlp_higgs_kernel(%arg0: i32, %arg1: memref<256x24xf32, #tpu.memory_space<vmem>>, %arg2: memref<24x256xf32, #tpu.memory_space<vmem>>, %arg3: memref<1x256xf32, #tpu.memory_space<vmem>>, %arg4: memref<256x256xf32, #tpu.memory_space<vmem>>, %arg5: memref<1x256xf32, #tpu.memory_space<vmem>>, %arg6: memref<256x128xf32, #tpu.memory_space<vmem>>, %arg7: memref<1x128xf32, #tpu.memory_space<vmem>>, %arg8: memref<256x128xf32, #tpu.memory_space<vmem>>) attributes {dimension_semantics = [#tpu.dimension_semantics<parallel>], iteration_bounds = array<i64: 2>, scalar_prefetch = 0 : i64, scratch_operands = 0 : i64, tpu.core_type = #tpu.core_type<tc>, window_params = [{transform_indices = @transform_0, window_bounds = array<i64: 256, 24>}, {pipeline_mode = #tpu.pipeline_mode<synchronous>, transform_indices = @transform_1, window_bounds = array<i64: 24, 256>}, {pipeline_mode = #tpu.pipeline_mode<synchronous>, transform_indices = @transform_2, window_bounds = array<i64: 1, 256>}, {pipeline_mode = #tpu.pipeline_mode<synchronous>, transform_indices = @transform_3, window_bounds = array<i64: 256, 256>}, {pipeline_mode = #tpu.pipeline_mode<synchronous>, transform_indices = @transform_4, window_bounds = array<i64: 1, 256>}, {pipeline_mode = #tpu.pipeline_mode<synchronous>, transform_indices = @transform_5, window_bounds = array<i64: 256, 128>}, {pipeline_mode = #tpu.pipeline_mode<synchronous>, transform_indices = @transform_6, window_bounds = array<i64: 1, 128>}, {transform_indices = @transform_7, window_bounds = array<i64: 256, 128>}]} {
    %c0 = arith.constant 0 : index
    %c0_0 = arith.constant 0 : index
    %0 = vector.load %arg1[%c0, %c0_0] : memref<256x24xf32, #tpu.memory_space<vmem>>, vector<256x24xf32>
    %c0_1 = arith.constant 0 : index
    %c0_2 = arith.constant 0 : index
    %1 = vector.load %arg2[%c0_1, %c0_2] : memref<24x256xf32, #tpu.memory_space<vmem>>, vector<24x256xf32>
    %cst = arith.constant dense<0.000000e+00> : vector<256x256xf32>
    %2 = tpu.matmul %0, %1, %cst {dimension_numbers = #tpu.dot_dimension_numbers<[1], [0], [0], [1], [0, 0, 1, 1], [], []>} : vector<256x24xf32>, vector<24x256xf32>, vector<256x256xf32> -> vector<256x256xf32>
    %c0_3 = arith.constant 0 : index
    %c0_4 = arith.constant 0 : index
    %3 = vector.load %arg3[%c0_3, %c0_4] : memref<1x256xf32, #tpu.memory_space<vmem>>, vector<1x256xf32>
    %4 = vector.broadcast %3 : vector<1x256xf32> to vector<256x256xf32>
    %5 = arith.addf %2, %4 : vector<256x256xf32>
    %cst_5 = arith.constant 0.000000e+00 : f32
    %6 = vector.broadcast %cst_5 : f32 to vector<256x256xf32>
    %7 = arith.maximumf %5, %6 : vector<256x256xf32>
    %c0_6 = arith.constant 0 : index
    %c0_7 = arith.constant 0 : index
    %8 = vector.load %arg4[%c0_6, %c0_7] : memref<256x256xf32, #tpu.memory_space<vmem>>, vector<256x256xf32>
    %cst_8 = arith.constant dense<0.000000e+00> : vector<256x256xf32>
    %9 = tpu.matmul %7, %8, %cst_8 {dimension_numbers = #tpu.dot_dimension_numbers<[1], [0], [0], [1], [0, 0, 1, 1], [], []>} : vector<256x256xf32>, vector<256x256xf32>, vector<256x256xf32> -> vector<256x256xf32>
    %c0_9 = arith.constant 0 : index
    %c0_10 = arith.constant 0 : index
    %10 = vector.load %arg5[%c0_9, %c0_10] : memref<1x256xf32, #tpu.memory_space<vmem>>, vector<1x256xf32>
    %11 = vector.broadcast %10 : vector<1x256xf32> to vector<256x256xf32>
    %12 = arith.addf %9, %11 : vector<256x256xf32>
    %cst_11 = arith.constant 0.000000e+00 : f32
    %13 = vector.broadcast %cst_11 : f32 to vector<256x256xf32>
    %14 = arith.maximumf %12, %13 : vector<256x256xf32>
    %c0_12 = arith.constant 0 : index
    %c0_13 = arith.constant 0 : index
    %15 = vector.load %arg6[%c0_12, %c0_13] : memref<256x128xf32, #tpu.memory_space<vmem>>, vector<256x128xf32>
    %cst_14 = arith.constant dense<0.000000e+00> : vector<256x128xf32>
    %16 = tpu.matmul %14, %15, %cst_14 {dimension_numbers = #tpu.dot_dimension_numbers<[1], [0], [0], [1], [0, 0, 1, 1], [], []>} : vector<256x256xf32>, vector<256x128xf32>, vector<256x128xf32> -> vector<256x128xf32>
    %c0_15 = arith.constant 0 : index
    %c0_16 = arith.constant 0 : index
    %17 = vector.load %arg7[%c0_15, %c0_16] : memref<1x128xf32, #tpu.memory_space<vmem>>, vector<1x128xf32>
    %18 = vector.broadcast %17 : vector<1x128xf32> to vector<256x128xf32>
    %19 = arith.addf %16, %18 : vector<256x128xf32>
    %c0_17 = arith.constant 0 : index
    %c0_18 = arith.constant 0 : index
    %20 = vector.load %arg8[%c0_17, %c0_18] : memref<256x128xf32, #tpu.memory_space<vmem>>, vector<256x128xf32>
    tpu.vector_store %arg8[%c0_17, %c0_18], %19 {strides = array<i32>} : memref<256x128xf32, #tpu.memory_space<vmem>>, vector<256x128xf32>,
    return
  }
  func.func @transform_0(%arg0: i32) -> (i32, i32) {
    %c0_i32 = arith.constant 0 : i32
    %c0_i32_0 = arith.constant 0 : i32
    return %arg0, %c0_i32 : i32, i32
  }
  func.func @transform_1(%arg0: i32) -> (i32, i32) {
    %c0_i32 = arith.constant 0 : i32
    %c0_i32_0 = arith.constant 0 : i32
    %c0_i32_1 = arith.constant 0 : i32
    return %c0_i32, %c0_i32_0 : i32, i32
  }
  func.func @transform_2(%arg0: i32) -> (i32, i32) {
    %c0_i32 = arith.constant 0 : i32
    %c0_i32_0 = arith.constant 0 : i32
    %c0_i32_1 = arith.constant 0 : i32
    return %c0_i32, %c0_i32_0 : i32, i32
  }
  func.func @transform_3(%arg0: i32) -> (i32, i32) {
    %c0_i32 = arith.constant 0 : i32
    %c0_i32_0 = arith.constant 0 : i32
    %c0_i32_1 = arith.constant 0 : i32
    return %c0_i32, %c0_i32_0 : i32, i32
  }
  func.func @transform_4(%arg0: i32) -> (i32, i32) {
    %c0_i32 = arith.constant 0 : i32
    %c0_i32_0 = arith.constant 0 : i32
    %c0_i32_1 = arith.constant 0 : i32
    return %c0_i32, %c0_i32_0 : i32, i32
  }
  func.func @transform_5(%arg0: i32) -> (i32, i32) {
    %c0_i32 = arith.constant 0 : i32
    %c0_i32_0 = arith.constant 0 : i32
    %c0_i32_1 = arith.constant 0 : i32
    return %c0_i32, %c0_i32_0 : i32, i32
  }
  func.func @transform_6(%arg0: i32) -> (i32, i32) {
    %c0_i32 = arith.constant 0 : i32
    %c0_i32_0 = arith.constant 0 : i32
    %c0_i32_1 = arith.constant 0 : i32
    return %c0_i32, %c0_i32_0 : i32, i32
  }
  func.func @transform_7(%arg0: i32) -> (i32, i32) {
    %c0_i32 = arith.constant 0 : i32
    %c0_i32_0 = arith.constant 0 : i32
    return %arg0, %c0_i32 : i32, i32
  }
}

</mosaic_0001>

<bundles_post_ra>
// kernel: tpu_custom_call.1
= control target key start
LH: loop header
LB: loop body
LE: loop exit
PB: predicated region body
PF: predicated region fallthrough
CT: control target
= control target key end

     0   :  { %12 = vsyncpa [#allocation3], 0  ;;  %s2699_s0 = inlined_call_operand.vmem [shape: f32[512,24], index: 0, kind: input, shape index: {}]   ;;  %s2700_s1 = inlined_call_operand.vmem [shape: f32[24,256], index: 1, kind: input, shape index: {}]   ;;  %s2701_s2 = inlined_call_operand.vmem [shape: f32[1,256], index: 2, kind: input, shape index: {}]   ;;  %s2702_s3 = inlined_call_operand.vmem [shape: f32[256,256], index: 3, kind: input, shape index: {}]   ;;  %s2703_s4 = inlined_call_operand.vmem [shape: f32[1,256], index: 4, kind: input, shape index: {}]   ;;  %s2704_s5 = inlined_call_operand.hbm [shape: f32[256,128], index: 5, kind: input, shape index: {}]   ;;  %s2705_s6 = inlined_call_operand.vmem [shape: f32[1,128], index: 6, kind: input, shape index: {}]   ;;  %s2706_s7 = inlined_call_operand.hbm [shape: f32[512,128], index: 7, kind: output, shape index: {}]  }
   0x1   :  { %13 = vsyncpa [#allocation4], 0 }
   0x2   :  { %15 = vsyncpa [#allocation4 + $0x1], 0  ;;  %s1912_s24 = smov 0   ;;  %s1914_s25 = smov 0  }
   0x3   :  { %s1916_s26 = smov 0   ;;  %s1918_s27 = smov 0  }
   0x4 LB: > { %s1933_s28 = sadd.s32 4294967295, %s1862_s27   ;;  %s1544_s29 = sadd.s32 4294967294, %s1862_s27   ;;  %s1862_s27 = sphi %s1918_s27, %s2722_s27   ;;  %s1858_s26 = sphi %s1916_s26, %s2721_s26   ;;  %s1854_s25 = sphi %s1914_s25, %s2720_s25   ;;  %s1850_s24 = sphi %s1912_s24, %s2719_s24  }
   0x5   : > { %s1937_s30 = sadd.s32 1, %s1862_s27   ;;  %s180_s8 = sadd.s32 1, %s1858_s26 }
   0x6   : > { %s177_s9 = ssub.s32 %s1862_s27, %s1937_s30  ;;  %p190_p0 = scmp.ne.s32.totalorder %s1858_s26, %s1854_s25 }
   0x7   : > { %p178_p1 = scmp.eq.s32.totalorder %s177_s9, 0  ;;  %p191_p2 = scmp.eq.s32.totalorder %s1933_s28, 1 }
   0x8   : > { %p196_p3 = scmp.ne.s32.totalorder %s1854_s25, %s1850_s24  ;;  %p197_p4 = scmp.eq.s32.totalorder %s1544_s29, 1 }
   0x9   : > { %s1948_s10 = scalar_select %p178_p1, %s1858_s26, %s180_s8  }
   0xa   : > { %p1950_p5 = por %p191_p2, %p190_p0  ;;  %p1954_p6 = por %p197_p4, %p196_p3 }
   0xb   : > { %p1545_p7 = scmp.ge.s32.totalorder %s1862_s27, 1  ;;  %p204_p8 = scmp.lt.s32.totalorder %s1862_s27, 3 }
   0xc   : > { %s2710_s11 = scalar_select %p1950_p5, 1, 0 }
   0xd   : > { %s2711_s12 = scalar_select %p1954_p6, 1, 0 }
   0xe   : > { %p2707_p9 = scmp.eq.s32.totalorder %s1933_s28, 0  ;;  %p1961_p10 = pnand %p1545_p7, %p204_p8 }
   0xf   : > { %s1864_s14 = smov [#allocation2]   ;;  %s1768_s19 = scalar_lea.hbm %s2704_s5, 4096 }
  0x10   : > { %s2712_s13 = scalar_select %p1961_p10, 1, 0 }
  0x11   : > { %s228_s15 = sshll.u32 %s1864_s14, 4  ;;  %p1718_p11 = pneg %p1961_p10  ;;  %s229_s15 = int_to_ptr.vmem [resolvable:$true] %s228_s15 }
  0x12   : > { %p1769_p13 = scmp.ne.s32.totalorder %s2704_s5, %s1768_s19  ;;  %p1775_p3 = scmp.lt.u32.totalorder %s1768_s19, %s2704_s5 }
  0x13   : > { %p1969_p12 = pnand %p2707_p9, %p1718_p11 }
  0x15   : > { %p1770_p0 = pneg %p1969_p12 }
  0x17   : > { %p1771_p1 = pnand %p1770_p0, %p1769_p13 }
  0x19   : > { %p1772_p2 = pneg %p1771_p1 }
  0x1b   : > { %p1777_p4 = pnand %p1775_p3, %p1772_p2 }
  0x1d   : > { %1780 = shalt.err (!%p1777_p4)
}
  0x1e   : > { %s1781_s29 = scalar_lea.vmem %s229_s15, 4096  ;;  %p1789_p9 = scmp.lt.s32.totalorder %s229_s15, %s229_s15 }
  0x1f   : > { %p1782_p7 = scmp.ne.s32.totalorder %s229_s15, %s1781_s29  ;;  %p1790_p6 = scmp.lt.s32.totalorder %s1781_s29, %s1781_s29 }
  0x21   : > { %p1784_p8 = pnand %p1782_p7, %p1770_p0  ;;  %p1791_p5 = por %p1790_p6, %p1789_p9 }
  0x23   : > { %p1785_p11 = pneg %p1784_p8 }
  0x25   : > { %p1792_p10 = pnand %p1791_p5, %p1785_p11 }
  0x27   : > { %1795 = shalt.err (!%p1792_p10)
}
  0x28   : > { %s1865_s8 = smov 128   ;;  %s1866_s9 = smov 8  }
  0x29   : > { %1721 = dma.hbm_to_vmem [thread:$0]  (!%p1969_p12), %s2704_s5, 4096, %s229_s15, [#allocation3], %s1865_s8, %s1865_s8, %s1866_s9  }
  0x2a   : > { %p2714_p13 = scmp.ne.s32.totalorder %s2712_s13, 0 }
  0x2b   : > { %p2715_p1 = scmp.eq.s32.totalorder (!%p2714_p13), %s1933_s28, 0 }
  0x2c   : > { %256 = sbr.rel (%p2714_p13) target bundleno = 850 (0x352), region = 48 }
  0x33   : > { %1841 = dma.done.wait (%p2715_p1), [#allocation3], 4096   ;;  %p2716_p0 = pmov %p2715_p1 }
  0x34   : > { %s1551_s18 = sshll.u32 %s1933_s28, 5  ;;  %v1867_v0 = vmov 0.0   ;;  %v328_v1 = vld [vmem:[%s2700_s1 + $0x8] sm:$0xff]  ;;  %v330_v2 = vld [vmem:[%s2700_s1 + $0x18] sm:$0xff]  ;;  %v327_v3 = vld [vmem:[%s2700_s1] sm:$0xff]  ;;  %vm345_vm0 = vcmask 195584  }
  0x35   : > { %1843 = vsyncadd (%p2716_p0), [#allocation3], 4294963200  ;;  %506 = vmatprep.mubr.f32.mxu0 %v1867_v0  ;;  %p289_p5 = scmp.lt.s32.totalorder %s1551_s18, 63  ;;  %602 = vmatprep.mubr.f32.mxu1 %v1867_v0  ;;  %v1592_v4 = vpack.c.bf16 %v330_v2, %v328_v1  ;;  %v329_v5 = vld [vmem:[%s2700_s1 + $0x10] sm:$0xff]  ;;  %v332_v7 = vld [vmem:[%s2700_s1 + $0x28] sm:$0xff]  ;;  %s285_s19 = sand.u32 1, %s1854_s25  }
  0x36   : > { %v1594_v6 = vpack.c.bf16 %v329_v5, %v327_v3  ;;  %v331_v8 = vld [vmem:[%s2700_s1 + $0x20] sm:$0xff]  ;;  %v764_v14 = vld [vmem:[%s2702_s3 + $0x8] sm:$0xff]  ;;  %v766_v15 = vld [vmem:[%s2702_s3 + $0x18] sm:$0xff]  ;;  %s1550_s20 = sshll.u32 %s285_s19, 8  ;;  %s1591_s23 = sshll.u32 %s1933_s28, 12 }
  0x37   : > { %s2724_s18 = smov (!%p289_p5, %s1551_s18), 63  ;;  %1593 = vmatprep.subr.bf16.mxu0 %v1592_v4  ;;  %1708 = vmatprep.subr.bf16.mxu1 %v1592_v4  ;;  %v763_v16 = vld [vmem:[%s2702_s3] sm:$0xff]  ;;  %v765_v17 = vld [vmem:[%s2702_s3 + $0x10] sm:$0xff]  ;;  %v1596_v19 = vpack.c.bf16 %v766_v15, %v764_v14  ;;  %v768_v20 = vld [vmem:[%s2702_s3 + $0x28] sm:$0xff]  ;;  %s2650_s14 = scalar_lea.hbm %s2706_s7, %s1591_s23 }
  0x38   : > { %s1552_s22 = sshll.u32 %s2724_s18, 3  ;;  %1595 = vmatpush1.bf16.msra.mxu0 %v1594_v6  ;;  %1710 = vmatpush1.bf16.msra.mxu1 %v1594_v6  ;;  %v770_v21 = vld [vmem:[%s2702_s3 + $0x38] sm:$0xff]  ;;  %v1598_v22 = vpack.c.bf16 %v765_v17, %v763_v16  ;;  %v767_v24 = vld [vmem:[%s2702_s3 + $0x20] sm:$0xff]  ;;  %v769_v25 = vld [vmem:[%s2702_s3 + $0x30] sm:$0xff]  ;;  %s2658_s17 = scalar_lea.sflag [#allocation4], %s285_s19 }
  0x39   : > { %s2016_s16 = scalar_lea.vmem %s2699_s0, %s1552_s22  ;;  %446 = vmatprep.subr.mxu0 %v332_v7  ;;  %1709 = vmatprep.subr.mxu1 %v332_v7  ;;  %v1600_v23 = vpack.c.bf16 %v770_v21, %v768_v20  ;;  %v772_v26 = vld [vmem:[%s2702_s3 + $0x48] sm:$0xff]  ;;  %v774_v27 = vld [vmem:[%s2702_s3 + $0x58] sm:$0xff]  ;;  %v1602_v30 = vpack.c.bf16 %v769_v25, %v767_v24  ;;  %v771_v32 = vld [vmem:[%s2702_s3 + $0x40] sm:$0xff]  ;;  %s2582_s22 = scalar_lea.vmem [#allocation5], %s1550_s20 }
  0x3a   : > { %v295_v9 = vld [vmem:[%s2016_s16] sm:$0xff]  ;;  %v296_v11 = vld [vmem:[%s2016_s16 + $0x8] sm:$0xff]  ;;  %v297_v13 = vld [vmem:[%s2016_s16 + $0x10] sm:$0xff]  ;;  %v1604_v31 = vpack.c.bf16 %v774_v27, %v772_v26  ;;  %s1470_s29 = sshll.u32 %s2582_s22, 4  ;;  %p2717_p9 = scmp.ne.s32.totalorder %s2710_s11, 0  ;;  %s2652_s29 = int_to_ptr.vmem [resolvable:$true] %s1470_s29 }
  0x3b   : > { %v311_v10 = vld [vmem:[%s2016_s16 + $0x80] sm:$0xff]  ;;  %v312_v12 = vld [vmem:[%s2016_s16 + $0x88] sm:$0xff]  ;;  %v313_v18 = vld [vmem:[%s2016_s16 + $0x90] sm:$0xff]  ;;  %s1796_s28 = scalar_lea.vmem %s2652_s29, 4096  ;;  %s1869_s18 = smov [#allocation5]  }
  0x3c   : > { %447 = vmatpush1.msra.mxu0 %v331_v8  ;;  %1711 = vmatpush1.msra.mxu1 %v331_v8  ;;  %v298_v28 = vld [vmem:[%s2016_s16 + $0x18] sm:$0xff]  ;;  %v773_v33 = vld [vmem:[%s2702_s3 + $0x50] sm:$0xff]  ;;  %v776_v34 = vld [vmem:[%s2702_s3 + $0x68] sm:$0xff]  ;;  %p1797_p6 = scmp.ne.s32.totalorder %s2652_s29, %s1796_s28  ;;  %s1800_s15 = sshll.u32 %s1869_s18, 4  ;;  %s1801_s15 = int_to_ptr.vmem [resolvable:$false] %s1800_s15 }
  0x3d   : > { %1553 = vmatmul.mubr.msk.f32.vlgmr.msra.gmra.mrb[0].mxu0 %vm345_vm0, %v295_v9  ;;  %1569 = vmatmul.mubr.msk.f32.vlgmr.msra.gmra.mrb[0].mxu1 %vm345_vm0, %v311_v10  ;;  %v314_v29 = vld [vmem:[%s2016_s16 + $0x98] sm:$0xff]  ;;  %v299_v36 = vld [vmem:[%s2016_s16 + $0x20] sm:$0xff]  ;;  %v1606_v38 = vpack.c.bf16 %v773_v33, %v771_v32  ;;  %v777_v41 = vld [vmem:[%s2702_s3 + $0x70] sm:$0xff]  ;;  %s1802_s13 = scalar_lea.vmem %s1801_s15, 8192  ;;  %p1803_p2 = scmp.lt.s32.totalorder %s2652_s29, %s1801_s15 }
  0x3e   : > { %512 = vmatprep.mubr.f32.mxu0 %v1867_v0  ;;  %608 = vmatprep.mubr.f32.mxu1 %v1867_v0  ;;  %v778_v35 = vld [vmem:[%s2702_s3 + $0x78] sm:$0xff]  ;;  %v315_v37 = vld [vmem:[%s2016_s16 + $0xa0] sm:$0xff]  ;;  %v780_v42 = vld [vmem:[%s2702_s3 + $0x88] sm:$0xff]  ;;  %p1798_p10 = pnand %p1797_p6, %p2717_p9  ;;  %p1804_p3 = scmp.lt.s32.totalorder %s1802_s13, %s1796_s28 }
  0x3f   : > { %1597 = vmatprep.subr.bf16.mxu1 %v1596_v19  ;;  %v1608_v39 = vpack.c.bf16 %v778_v35, %v776_v34  ;;  %v775_v40 = vld [vmem:[%s2702_s3 + $0x60] sm:$0xff]  ;;  %v782_v43 = vld [vmem:[%s2702_s3 + $0x98] sm:$0xff]  ;;  %v300_v44 = vld [vmem:[%s2016_s16 + $0x28] sm:$0xff] }
  0x40   : > { %1599 = vmatpush1.bf16.msra.mxu1 %v1598_v22  ;;  %v316_v45 = vld [vmem:[%s2016_s16 + $0xa8] sm:$0xff]  ;;  %v1610_v46 = vpack.c.bf16 %v777_v41, %v775_v40  ;;  %v1612_v47 = vpack.c.bf16 %v782_v43, %v780_v42  ;;  %v779_v48 = vld [vmem:[%s2702_s3 + $0x80] sm:$0xff]  ;;  %v781_v49 = vld [vmem:[%s2702_s3 + $0x90] sm:$0xff]  ;;  %p1799_p12 = pneg %p1798_p10  ;;  %p1805_p4 = por %p1804_p3, %p1803_p2 }
  0x41   : > { %1554 = vmatmul.mubr.msk.f32.gmra.mrb[2].mxu0 %vm345_vm0, %v296_v11  ;;  %1570 = vmatmul.mubr.msk.f32.gmra.mrb[2].mxu1 %vm345_vm0, %v312_v12  ;;  %v784_v50 = vld [vmem:[%s2702_s3 + $0xa8] sm:$0xff]  ;;  %v786_v51 = vld [vmem:[%s2702_s3 + $0xb8] sm:$0xff]  ;;  %v301_v52 = vld [vmem:[%s2016_s16 + $0x30] sm:$0xff]  ;;  %v1614_v54 = vpack.c.bf16 %v781_v49, %v779_v48 }
  0x42   : > { %518 = vmatprep.mubr.f32.mxu0 %v1867_v0  ;;  %614 = vmatprep.mubr.f32.mxu1 %v1867_v0  ;;  %v317_v53 = vld [vmem:[%s2016_s16 + $0xb0] sm:$0xff]  ;;  %v1616_v55 = vpack.c.bf16 %v786_v51, %v784_v50  ;;  %v783_v56 = vld [vmem:[%s2702_s3 + $0xa0] sm:$0xff]  ;;  %v788_v58 = vld [vmem:[%s2702_s3 + $0xc8] sm:$0xff]  ;;  %p1806_p7 = pnand %p1805_p4, %p1799_p12 }
  0x43   : > { %1601 = vmatprep.subr.bf16.mxu1 %v1600_v23  ;;  %v785_v57 = vld [vmem:[%s2702_s3 + $0xb0] sm:$0xff]  ;;  %v790_v59 = vld [vmem:[%s2702_s3 + $0xd8] sm:$0xff]  ;;  %v787_v1 = vld [vmem:[%s2702_s3 + $0xc0] sm:$0xff] }
  0x44   : > { %1603 = vmatpush1.bf16.msra.mxu1 %v1602_v30  ;;  %v302_v60 = vld [vmem:[%s2016_s16 + $0x38] sm:$0xff]  ;;  %v1618_v62 = vpack.c.bf16 %v785_v57, %v783_v56  ;;  %v1620_v63 = vpack.c.bf16 %v790_v59, %v788_v58  ;;  %v789_v2 = vld [vmem:[%s2702_s3 + $0xd0] sm:$0xff]  ;;  %v792_v3 = vld [vmem:[%s2702_s3 + $0xe8] sm:$0xff] }
  0x45   : > { %1555 = vmatmul.mubr.msk.f32.gmra.mrb[4].mxu0 %vm345_vm0, %v297_v13  ;;  %1571 = vmatmul.mubr.msk.f32.gmra.mrb[4].mxu1 %vm345_vm0, %v313_v18  ;;  %v318_v61 = vld [vmem:[%s2016_s16 + $0xb8] sm:$0xff]  ;;  %v303_v5 = vld [vmem:[%s2016_s16 + $0x40] sm:$0xff]  ;;  %v1622_v7 = vpack.c.bf16 %v789_v2, %v787_v1  ;;  %v793_v10 = vld [vmem:[%s2702_s3 + $0xf0] sm:$0xff] }
  0x46   : > { %524 = vmatprep.mubr.f32.mxu0 %v1867_v0  ;;  %620 = vmatprep.mubr.f32.mxu1 %v1867_v0  ;;  %v794_v4 = vld [vmem:[%s2702_s3 + $0xf8] sm:$0xff]  ;;  %v319_v6 = vld [vmem:[%s2016_s16 + $0xc0] sm:$0xff]  ;;  %v796_v11 = vld [vmem:[%s2702_s3 + $0x108] sm:$0xff] }
  0x47   : > { %1605 = vmatprep.subr.bf16.mxu1 %v1604_v31  ;;  %v1624_v8 = vpack.c.bf16 %v794_v4, %v792_v3  ;;  %v791_v9 = vld [vmem:[%s2702_s3 + $0xe0] sm:$0xff]  ;;  %v798_v12 = vld [vmem:[%s2702_s3 + $0x118] sm:$0xff]  ;;  %v304_v13 = vld [vmem:[%s2016_s16 + $0x48] sm:$0xff] }
  0x48   : > { %1607 = vmatpush1.bf16.msra.mxu1 %v1606_v38  ;;  %v320_v14 = vld [vmem:[%s2016_s16 + $0xc8] sm:$0xff]  ;;  %v1626_v15 = vpack.c.bf16 %v793_v10, %v791_v9  ;;  %v1628_v16 = vpack.c.bf16 %v798_v12, %v796_v11  ;;  %v795_v17 = vld [vmem:[%s2702_s3 + $0x100] sm:$0xff]  ;;  %v797_v18 = vld [vmem:[%s2702_s3 + $0x110] sm:$0xff]  ;;  %v335_v10 = vlaneseq }
  0x49   : > { %1556 = vmatmul.mubr.msk.f32.gmra.mrb[6].mxu0 %vm345_vm0, %v298_v28  ;;  %1572 = vmatmul.mubr.msk.f32.gmra.mrb[6].mxu1 %vm345_vm0, %v314_v29  ;;  %v800_v19 = vld [vmem:[%s2702_s3 + $0x128] sm:$0xff]  ;;  %v802_v20 = vld [vmem:[%s2702_s3 + $0x138] sm:$0xff]  ;;  %v305_v21 = vld [vmem:[%s2016_s16 + $0x50] sm:$0xff]  ;;  %v1630_v23 = vpack.c.bf16 %v797_v18, %v795_v17 }
  0x4a   : > { %530 = vmatprep.mubr.f32.mxu0 %v1867_v0  ;;  %626 = vmatprep.mubr.f32.mxu1 %v1867_v0  ;;  %v321_v22 = vld [vmem:[%s2016_s16 + $0xd0] sm:$0xff]  ;;  %v1632_v24 = vpack.c.bf16 %v802_v20, %v800_v19  ;;  %v799_v25 = vld [vmem:[%s2702_s3 + $0x120] sm:$0xff]  ;;  %v804_v27 = vld [vmem:[%s2702_s3 + $0x148] sm:$0xff]  ;;  %v2307_v11 = vshrl.u32 %v335_v10, 7 }
  0x4b   : > { %1609 = vmatprep.subr.bf16.mxu1 %v1608_v39  ;;  %v801_v26 = vld [vmem:[%s2702_s3 + $0x130] sm:$0xff]  ;;  %v806_v28 = vld [vmem:[%s2702_s3 + $0x158] sm:$0xff]  ;;  %v803_v33 = vld [vmem:[%s2702_s3 + $0x140] sm:$0xff] }
  0x4c   : > { %1611 = vmatpush1.bf16.msra.mxu1 %v1610_v46  ;;  %v306_v29 = vld [vmem:[%s2016_s16 + $0x58] sm:$0xff]  ;;  %v1634_v31 = vpack.c.bf16 %v801_v26, %v799_v25  ;;  %v1636_v32 = vpack.c.bf16 %v806_v28, %v804_v27  ;;  %v805_v34 = vld [vmem:[%s2702_s3 + $0x150] sm:$0xff]  ;;  %v808_v35 = vld [vmem:[%s2702_s3 + $0x168] sm:$0xff]  ;;  %v337_v12 = vsub.s32 0, %v2307_v11 }
  0x4d   : > { %1557 = vmatmul.mubr.msk.f32.gmra.mrb[8].mxu0 %vm345_vm0, %v299_v36  ;;  %1573 = vmatmul.mubr.msk.f32.gmra.mrb[8].mxu1 %vm345_vm0, %v315_v37  ;;  %v322_v30 = vld [vmem:[%s2016_s16 + $0xd8] sm:$0xff]  ;;  %v307_v37 = vld [vmem:[%s2016_s16 + $0x60] sm:$0xff]  ;;  %v1638_v39 = vpack.c.bf16 %v805_v34, %v803_v33  ;;  %v809_v42 = vld [vmem:[%s2702_s3 + $0x170] sm:$0xff] }
  0x4e   : > { %536 = vmatprep.mubr.f32.mxu0 %v1867_v0  ;;  %632 = vmatprep.mubr.f32.mxu1 %v1867_v0  ;;  %v810_v36 = vld [vmem:[%s2702_s3 + $0x178] sm:$0xff]  ;;  %v323_v38 = vld [vmem:[%s2016_s16 + $0xe0] sm:$0xff]  ;;  %v812_v43 = vld [vmem:[%s2702_s3 + $0x188] sm:$0xff] }
  0x4f   : > { %1613 = vmatprep.subr.bf16.mxu1 %v1612_v47  ;;  %v1640_v40 = vpack.c.bf16 %v810_v36, %v808_v35  ;;  %v807_v41 = vld [vmem:[%s2702_s3 + $0x160] sm:$0xff]  ;;  %v324_v46 = vld [vmem:[%s2016_s16 + $0xe8] sm:$0xff]  ;;  %v813_v50 = vld [vmem:[%s2702_s3 + $0x190] sm:$0xff] }
  0x50   : > { %1615 = vmatpush1.bf16.msra.mxu1 %v1614_v54  ;;  %v1642_v47 = vpack.c.bf16 %v809_v42, %v807_v41  ;;  %v811_v49 = vld [vmem:[%s2702_s3 + $0x180] sm:$0xff]  ;;  %v816_v51 = vld [vmem:[%s2702_s3 + $0x1a8] sm:$0xff]  ;;  %v325_v54 = vld [vmem:[%s2016_s16 + $0xf0] sm:$0xff] }
  0x51   : > { %1558 = vmatmul.mubr.msk.f32.gmra.mrb[10].mxu0 %vm345_vm0, %v300_v44  ;;  %1574 = vmatmul.mubr.msk.f32.gmra.mrb[10].mxu1 %vm345_vm0, %v316_v45  ;;  %v814_v44 = vld [vmem:[%s2702_s3 + $0x198] sm:$0xff]  ;;  %v308_v45 = vld [vmem:[%s2016_s16 + $0x68] sm:$0xff]  ;;  %v815_v57 = vld [vmem:[%s2702_s3 + $0x1a0] sm:$0xff] }
  0x52   : > { %542 = vmatprep.mubr.f32.mxu0 %v1867_v0  ;;  %638 = vmatprep.mubr.f32.mxu1 %v1867_v0  ;;  %v1644_v48 = vpack.c.bf16 %v814_v44, %v812_v43  ;;  %v817_v58 = vld [vmem:[%s2702_s3 + $0x1b0] sm:$0xff]  ;;  %v820_v59 = vld [vmem:[%s2702_s3 + $0x1c8] sm:$0xff]  ;;  %v819_v2 = vld [vmem:[%s2702_s3 + $0x1c0] sm:$0xff] }
  0x53   : > { %1617 = vmatprep.subr.bf16.mxu1 %v1616_v55  ;;  %v1646_v55 = vpack.c.bf16 %v813_v50, %v811_v49  ;;  %v821_v3 = vld [vmem:[%s2702_s3 + $0x1d0] sm:$0xff]  ;;  %v1161_v25 = vld [vmem:[#allocation2 + $0x8] sm:$0xff]  ;;  %v1164_v41 = vld [vmem:[#allocation2 + $0x20] sm:$0xff] }
  0x54   : > { %1619 = vmatpush1.bf16.msra.mxu1 %v1618_v62  ;;  %v326_v62 = vld [vmem:[%s2016_s16 + $0xf8] sm:$0xff]  ;;  %v1654_v4 = vpack.c.bf16 %v821_v3, %v819_v2  ;;  %v1162_v26 = vld [vmem:[#allocation2 + $0x10] sm:$0xff]  ;;  %v1165_v42 = vld [vmem:[#allocation2 + $0x28] sm:$0xff] }
  0x55   : > { %1559 = vmatmul.mubr.msk.f32.gmra.mrb[12].mxu0 %vm345_vm0, %v301_v52  ;;  %1575 = vmatmul.mubr.msk.f32.gmra.mrb[12].mxu1 %vm345_vm0, %v317_v53  ;;  %v818_v52 = vld [vmem:[%s2702_s3 + $0x1b8] sm:$0xff]  ;;  %v309_v53 = vld [vmem:[%s2016_s16 + $0x70] sm:$0xff] }
  0x56   : > { %548 = vmatprep.mubr.f32.mxu0 %v1867_v0  ;;  %644 = vmatprep.mubr.f32.mxu1 %v1867_v0  ;;  %v1648_v56 = vpack.c.bf16 %v818_v52, %v816_v51 }
  0x57   : > { %1621 = vmatprep.subr.bf16.mxu1 %v1620_v63  ;;  %v1650_v63 = vpack.c.bf16 %v817_v58, %v815_v57 }
  0x58   : > { %1623 = vmatpush1.bf16.msra.mxu1 %v1622_v7  ;;  %v823_v7 = vld [vmem:[%s2702_s3 + $0x1e0] sm:$0xff] }
  0x59   : > { %1560 = vmatmul.mubr.msk.f32.gmra.mrb[14].mxu0 %vm345_vm0, %v302_v60  ;;  %1576 = vmatmul.mubr.msk.f32.gmra.mrb[14].mxu1 %vm345_vm0, %v318_v61  ;;  %v822_v60 = vld [vmem:[%s2702_s3 + $0x1d8] sm:$0xff] }
  0x5a   : > { %554 = vmatprep.mubr.f32.mxu0 %v1867_v0  ;;  %650 = vmatprep.mubr.f32.mxu1 %v1867_v0  ;;  %v310_v61 = vld [vmem:[%s2016_s16 + $0x78] sm:$0xff]  ;;  %v1652_v1 = vpack.c.bf16 %v822_v60, %v820_v59 }
  0x5b   : > { %1625 = vmatprep.subr.bf16.mxu1 %v1624_v8  ;;  %v825_v8 = vld [vmem:[%s2702_s3 + $0x1f0] sm:$0xff] }
  0x5c   : > { %1627 = vmatpush1.bf16.msra.mxu1 %v1626_v15  ;;  %v1658_v9 = vpack.c.bf16 %v825_v8, %v823_v7 }
  0x5d   : > { %1561 = vmatmul.mubr.msk.f32.gmra.mrb[16].mxu0 %vm345_vm0, %v303_v5  ;;  %1577 = vmatmul.mubr.msk.f32.gmra.mrb[16].mxu1 %vm345_vm0, %v319_v6  ;;  %v826_v5 = vld [vmem:[%s2702_s3 + $0x1f8] sm:$0xff] }
  0x5e   : > { %560 = vmatprep.mubr.f32.mxu0 %v1867_v0  ;;  %656 = vmatprep.mubr.f32.mxu1 %v1867_v0 }
  0x5f   : > { %1629 = vmatprep.subr.bf16.mxu1 %v1628_v16 }
  0x60   : > { %1631 = vmatpush1.bf16.msra.mxu1 %v1630_v23 }
  0x61   : > { %1562 = vmatmul.mubr.msk.f32.gmra.mrb[18].mxu0 %vm345_vm0, %v304_v13  ;;  %1578 = vmatmul.mubr.msk.f32.gmra.mrb[18].mxu1 %vm345_vm0, %v320_v14  ;;  %v333_v13 = vld [vmem:[%s2701_s2] sm:$0x3]  ;;  %v341_v14 = vsub.s32 1, %v2307_v11 }
  0x62   : > { %566 = vmatprep.mubr.f32.mxu0 %v1867_v0  ;;  %662 = vmatprep.mubr.f32.mxu1 %v1867_v0  ;;  %v2316_v15 = vrot.slane %v333_v13, %v337_v12 }
  0x63   : > { %1633 = vmatprep.subr.bf16.mxu1 %v1632_v24  ;;  %v2320_v16 = vrot.slane %v333_v13, %v341_v14  ;;  %v1160_v24 = vld [vmem:[#allocation2] sm:$0xff] }
  0x64   : > { %1635 = vmatpush1.bf16.msra.mxu1 %v1634_v31  ;;  %v1661_v31 = vpack.c.bf16 %v1161_v25, %v1160_v24  ;;  %v1171_v24 = vld [vmem:[#allocation2 + $0x58] sm:$0xff] }
  0x65   : > { %1563 = vmatmul.mubr.msk.f32.gmra.mrb[20].mxu0 %vm345_vm0, %v305_v21  ;;  %1579 = vmatmul.mubr.msk.f32.gmra.mrb[20].mxu1 %vm345_vm0, %v321_v22 }
  0x66   : > { %572 = vmatprep.mubr.f32.mxu0 %v1867_v0  ;;  %668 = vmatprep.mubr.f32.mxu1 %v1867_v0 }
  0x67   : > { %1637 = vmatprep.subr.bf16.mxu1 %v1636_v32  ;;  %v1163_v32 = vld [vmem:[#allocation2 + $0x18] sm:$0xff] }
  0x68   : > { %1639 = vmatpush1.bf16.msra.mxu1 %v1638_v39 }
  0x69   : > { %1564 = vmatmul.mubr.msk.f32.gmra.mrb[22].mxu0 %vm345_vm0, %v306_v29  ;;  %1580 = vmatmul.mubr.msk.f32.gmra.mrb[22].mxu1 %vm345_vm0, %v322_v30  ;;  %v1868_v30 = vmov 0.0|0.0  }
  0x6a   : > { %578 = vmatprep.mubr.f32.mxu0 %v1867_v0  ;;  %674 = vmatprep.mubr.f32.mxu1 %v1867_v0 }
  0x6b   : > { %1641 = vmatprep.subr.bf16.mxu1 %v1640_v40  ;;  %1660 = vmatprep.subr.bf16.mxu0 %v1868_v30  ;;  %v1664_v40 = vpack.c.bf16 %v1163_v32, %v1162_v26 }
  0x6c   : > { %1643 = vmatpush1.bf16.msra.mxu1 %v1642_v47  ;;  %1662 = vmatpush1.bf16.msra.mxu0 %v1661_v31 }
  0x6d   : > { %1565 = vmatmul.mubr.msk.f32.gmra.mrb[24].mxu0 %vm345_vm0, %v307_v37  ;;  %1581 = vmatmul.mubr.msk.f32.gmra.mrb[24].mxu1 %vm345_vm0, %v323_v38 }
  0x6e   : > { %584 = vmatprep.mubr.f32.mxu0 %v1867_v0  ;;  %680 = vmatprep.mubr.f32.mxu1 %v1867_v0 }
  0x6f   : > { %1645 = vmatprep.subr.bf16.mxu1 %v1644_v48  ;;  %1663 = vmatprep.subr.bf16.mxu0 %v1868_v30 }
  0x70   : > { %1647 = vmatpush1.bf16.msra.mxu1 %v1646_v55  ;;  %1665 = vmatpush1.bf16.msra.mxu0 %v1664_v40  ;;  %v1167_v55 = vld [vmem:[#allocation2 + $0x38] sm:$0xff]  ;;  %v1173_v40 = vld [vmem:[#allocation2 + $0x68] sm:$0xff] }
  0x71   : > { %1566 = vmatmul.mubr.msk.f32.gmra.mrb[26].mxu0 %vm345_vm0, %v308_v45  ;;  %1582 = vmatmul.mubr.msk.f32.gmra.mrb[26].mxu1 %vm345_vm0, %v324_v46 }
  0x72   : > { %590 = vmatprep.mubr.f32.mxu0 %v1867_v0  ;;  %686 = vmatprep.mubr.f32.mxu1 %v1867_v0 }
  0x73   : > { %1649 = vmatprep.subr.bf16.mxu1 %v1648_v56  ;;  %1666 = vmatprep.subr.bf16.mxu0 %v1868_v30 }
  0x74   : > { %1651 = vmatpush1.bf16.msra.mxu1 %v1650_v63 }
  0x75   : > { %1567 = vmatmul.mubr.msk.f32.gmra.mrb[28].mxu0 %vm345_vm0, %v309_v53  ;;  %1583 = vmatmul.mubr.msk.f32.gmra.mrb[28].mxu1 %vm345_vm0, %v325_v54  ;;  %v1667_v53 = vpack.c.bf16 %v1165_v42, %v1164_v41  ;;  %v1166_v54 = vld [vmem:[#allocation2 + $0x30] sm:$0xff] }
  0x76   : > { %596 = vmatprep.mubr.f32.mxu0 %v1867_v0  ;;  %692 = vmatprep.mubr.f32.mxu1 %v1867_v0  ;;  %v824_v0 = vld [vmem:[%s2702_s3 + $0x1e8] sm:$0xff]  ;;  %v1670_v3 = vpack.c.bf16 %v1167_v55, %v1166_v54  ;;  %v1174_v54 = vld [vmem:[#allocation2 + $0x70] sm:$0xff]  ;;  %v1175_v55 = vld [vmem:[#allocation2 + $0x78] sm:$0xff] }
  0x77   : > { %1653 = vmatprep.subr.bf16.mxu1 %v1652_v1  ;;  %v1656_v6 = vpack.c.bf16 %v826_v5, %v824_v0  ;;  %1668 = vmatpush1.bf16.msra.mxu0 %v1667_v53  ;;  %v1169_v0 = vld [vmem:[#allocation2 + $0x48] sm:$0xff] }
  0x78   : > { %1655 = vmatpush1.bf16.msra.mxu1 %v1654_v4  ;;  %1669 = vmatprep.subr.bf16.mxu0 %v1868_v30  ;;  %v1168_v4 = vld [vmem:[#allocation2 + $0x40] sm:$0xff] }
  0x79   : > { %1568 = vmatmul.mubr.msk.f32.gmra.mrb[30].mxu0 %vm345_vm0, %v310_v61  ;;  %1584 = vmatmul.mubr.msk.f32.gmra.mrb[30].mxu1 %vm345_vm0, %v326_v62 }
  0x7a   : > { %1657 = vmatprep.subr.bf16.mxu1 %v1656_v6 }
  0x7b   : > { %1671 = vmatpush1.bf16.msra.mxu0 %v1670_v3 }
  0x7c   : > { %1659 = vmatpush1.bf16.msra.mxu1 %v1658_v9  ;;  %1672 = vmatprep.subr.bf16.mxu0 %v1868_v30 }
 0x110   : > { %v508_v17 = vpop.f32.mrb[0].mxu0  ;;  %v604_v18 = vpop.f32.mrb[0].mxu1 }
 0x111   : > { %v509_v19 = vadd.f32 %v508_v17, %v2316_v15  ;;  %v510_v20 = vpop.f32.mrb[1].mxu0  ;;  %v2324_v21 = vadd.f32 %v604_v18, %v2316_v15  ;;  %v2326_v22 = vpop.f32.mrb[1].mxu1 }
 0x112   : > { %v511_v23 = vadd.f32 %v510_v20, %v2320_v16  ;;  %v1673_v20 = vpack.c.bf16 %v1169_v0, %v1168_v4  ;;  %v1682_v0 = vpack.c.bf16 %v1175_v55, %v1174_v54 }
 0x113   : > { %v699_v33 = vmax.f32 %v509_v19, 0.0 }
 0x114   : > { %v700_v27 = vmax.f32 %v511_v23, 0.0  ;;  %v514_v28 = vpop.f32.mrb[2].mxu0  ;;  %v610_v29 = vpop.f32.mrb[2].mxu1  ;;  %v1170_v23 = vld [vmem:[#allocation2 + $0x50] sm:$0xff]  ;;  %1674 = vmatpush1.bf16.msra.mxu0 %v1673_v20 }
 0x115   : > { %v515_v34 = vadd.f32 %v514_v28, %v2316_v15  ;;  %v516_v35 = vpop.f32.mrb[3].mxu0  ;;  %v2332_v36 = vadd.f32 %v610_v29, %v2316_v15  ;;  %v612_v37 = vpop.f32.mrb[3].mxu1  ;;  %1675 = vmatprep.subr.bf16.mxu0 %v1868_v30 }
 0x116   : > { %v517_v38 = vadd.f32 %v516_v35, %v2320_v16  ;;  %903 = vmatprep.mubr.f32.mxu1 %v700_v27  ;;  %v2336_v39 = vadd.f32 %v612_v37, %v2320_v16  ;;  %v1676_v37 = vpack.c.bf16 %v1171_v24, %v1170_v23 }
 0x117   : > { %904 = vmatmul.mubr.f32.vlgmr.msra.gmra.mrb[32].mxu1 %v699_v33  ;;  %v701_v46 = vmax.f32 %v515_v34, 0.0 }
 0x118   : > { %v702_v43 = vmax.f32 %v517_v38, 0.0  ;;  %v520_v44 = vpop.f32.mrb[4].mxu0  ;;  %v616_v45 = vpop.f32.mrb[4].mxu1  ;;  %v1172_v38 = vld [vmem:[#allocation2 + $0x60] sm:$0xff]  ;;  %1677 = vmatpush1.bf16.msra.mxu0 %v1676_v37 }
 0x119   : > { %v521_v47 = vadd.f32 %v520_v44, %v2316_v15  ;;  %v522_v48 = vpop.f32.mrb[5].mxu0  ;;  %v2341_v49 = vadd.f32 %v616_v45, %v2316_v15  ;;  %v618_v50 = vpop.f32.mrb[5].mxu1  ;;  %v1679_v53 = vpack.c.bf16 %v1173_v40, %v1172_v38  ;;  %1678 = vmatprep.subr.bf16.mxu0 %v1868_v30 }
 0x11a   : > { %v523_v51 = vadd.f32 %v522_v48, %v2320_v16  ;;  %909 = vmatprep.mubr.f32.mxu1 %v702_v43  ;;  %v2345_v52 = vadd.f32 %v618_v50, %v2320_v16 }
 0x11b   : > { %910 = vmatmul.mubr.f32.gmra.mrb[34].mxu1 %v701_v46  ;;  %v703_v59 = vmax.f32 %v521_v47, 0.0 }
 0x11c   : > { %v704_v56 = vmax.f32 %v523_v51, 0.0  ;;  %v526_v57 = vpop.f32.mrb[6].mxu0  ;;  %v622_v58 = vpop.f32.mrb[6].mxu1  ;;  %1680 = vmatpush1.bf16.msra.mxu0 %v1679_v53 }
 0x11d   : > { %v527_v60 = vadd.f32 %v526_v57, %v2316_v15  ;;  %v528_v61 = vpop.f32.mrb[7].mxu0  ;;  %v2350_v62 = vadd.f32 %v622_v58, %v2316_v15  ;;  %v624_v63 = vpop.f32.mrb[7].mxu1  ;;  %1681 = vmatprep.subr.bf16.mxu0 %v1868_v30 }
 0x11e   : > { %v529_v1 = vadd.f32 %v528_v61, %v2320_v16  ;;  %915 = vmatprep.mubr.f32.mxu1 %v704_v56  ;;  %v2354_v2 = vadd.f32 %v624_v63, %v2320_v16 }
 0x11f   : > { %916 = vmatmul.mubr.f32.gmra.mrb[36].mxu1 %v703_v59  ;;  %v705_v8 = vmax.f32 %v527_v60, 0.0 }
 0x120   : > { %v706_v5 = vmax.f32 %v529_v1, 0.0  ;;  %v532_v6 = vpop.f32.mrb[8].mxu0  ;;  %v628_v7 = vpop.f32.mrb[8].mxu1  ;;  %1683 = vmatpush1.bf16.msra.mxu0 %v1682_v0 }
 0x121   : > { %v533_v9 = vadd.f32 %v532_v6, %v2316_v15  ;;  %v534_v10 = vpop.f32.mrb[9].mxu0  ;;  %v2359_v13 = vadd.f32 %v628_v7, %v2316_v15  ;;  %v630_v17 = vpop.f32.mrb[9].mxu1  ;;  %v1177_v6 = vld [vmem:[#allocation2 + $0x88] sm:$0xff]  ;;  %1684 = vmatprep.subr.bf16.mxu0 %v1868_v30 }
 0x122   : > { %v535_v18 = vadd.f32 %v534_v10, %v2320_v16  ;;  %921 = vmatprep.mubr.f32.mxu1 %v706_v5  ;;  %v2363_v19 = vadd.f32 %v630_v17, %v2320_v16  ;;  %v1176_v5 = vld [vmem:[#allocation2 + $0x80] sm:$0xff] }
 0x123   : > { %922 = vmatmul.mubr.f32.gmra.mrb[38].mxu1 %v705_v8  ;;  %v707_v28 = vmax.f32 %v533_v9, 0.0 }
 0x124   : > { %v708_v25 = vmax.f32 %v535_v18, 0.0  ;;  %v538_v26 = vpop.f32.mrb[10].mxu0  ;;  %v634_v27 = vpop.f32.mrb[10].mxu1 }
 0x125   : > { %v539_v29 = vadd.f32 %v538_v26, %v2316_v15  ;;  %v540_v31 = vpop.f32.mrb[11].mxu0  ;;  %v2368_v32 = vadd.f32 %v634_v27, %v2316_v15  ;;  %v636_v33 = vpop.f32.mrb[11].mxu1  ;;  %v1685_v26 = vpack.c.bf16 %v1177_v6, %v1176_v5  ;;  %v1178_v27 = vld [vmem:[#allocation2 + $0x90] sm:$0xff] }
 0x126   : > { %v541_v34 = vadd.f32 %v540_v31, %v2320_v16  ;;  %927 = vmatprep.mubr.f32.mxu1 %v708_v25  ;;  %v2372_v35 = vadd.f32 %v636_v33, %v2320_v16 }
 0x127   : > { %928 = vmatmul.mubr.f32.gmra.mrb[40].mxu1 %v707_v28  ;;  %v709_v44 = vmax.f32 %v539_v29, 0.0  ;;  %v1179_v28 = vld [vmem:[#allocation2 + $0x98] sm:$0xff]  ;;  %1686 = vmatpush1.bf16.msra.mxu0 %v1685_v26  ;;  %v1184_v26 = vld [vmem:[#allocation2 + $0xc0] sm:$0xff] }
 0x128   : > { %v710_v41 = vmax.f32 %v541_v34, 0.0  ;;  %v544_v42 = vpop.f32.mrb[12].mxu0  ;;  %v640_v43 = vpop.f32.mrb[12].mxu1  ;;  %1687 = vmatprep.subr.bf16.mxu0 %v1868_v30 }
 0x129   : > { %v545_v45 = vadd.f32 %v544_v42, %v2316_v15  ;;  %v546_v46 = vpop.f32.mrb[13].mxu0  ;;  %v2377_v47 = vadd.f32 %v640_v43, %v2316_v15  ;;  %v642_v48 = vpop.f32.mrb[13].mxu1 }
 0x12a   : > { %v547_v50 = vadd.f32 %v546_v46, %v2320_v16  ;;  %933 = vmatprep.mubr.f32.mxu1 %v710_v41  ;;  %v2381_v51 = vadd.f32 %v642_v48, %v2320_v16  ;;  %v1181_v46 = vld [vmem:[#allocation2 + $0xa8] sm:$0xff] }
 0x12b   : > { %934 = vmatmul.mubr.f32.gmra.mrb[42].mxu1 %v709_v44  ;;  %v711_v59 = vmax.f32 %v545_v45, 0.0  ;;  %v1688_v44 = vpack.c.bf16 %v1179_v28, %v1178_v27  ;;  %v1180_v45 = vld [vmem:[#allocation2 + $0xa0] sm:$0xff]  ;;  %v1185_v27 = vld [vmem:[#allocation2 + $0xc8] sm:$0xff] }
 0x12c   : > { %v712_v56 = vmax.f32 %v547_v50, 0.0  ;;  %v550_v57 = vpop.f32.mrb[14].mxu0  ;;  %v646_v58 = vpop.f32.mrb[14].mxu1 }
 0x12d   : > { %v551_v60 = vadd.f32 %v550_v57, %v2316_v15  ;;  %v552_v61 = vpop.f32.mrb[15].mxu0  ;;  %v2386_v63 = vadd.f32 %v646_v58, %v2316_v15  ;;  %v648_v1 = vpop.f32.mrb[15].mxu1  ;;  %1689 = vmatpush1.bf16.msra.mxu0 %v1688_v44 }
 0x12e   : > { %v553_v3 = vadd.f32 %v552_v61, %v2320_v16  ;;  %939 = vmatprep.mubr.f32.mxu1 %v712_v56  ;;  %v2390_v4 = vadd.f32 %v648_v1, %v2320_v16  ;;  %v1691_v61 = vpack.c.bf16 %v1181_v46, %v1180_v45  ;;  %1690 = vmatprep.subr.bf16.mxu0 %v1868_v30  ;;  %v1182_v1 = vld [vmem:[#allocation2 + $0xb0] sm:$0xff] }
 0x12f   : > { %940 = vmatmul.mubr.f32.gmra.mrb[44].mxu1 %v711_v59  ;;  %v713_v10 = vmax.f32 %v551_v60, 0.0  ;;  %v1697_v45 = vpack.c.bf16 %v1185_v27, %v1184_v26  ;;  %v1186_v46 = vld [vmem:[#allocation2 + $0xd0] sm:$0xff] }
 0x130   : > { %v714_v7 = vmax.f32 %v553_v3, 0.0  ;;  %v556_v8 = vpop.f32.mrb[16].mxu0  ;;  %v652_v9 = vpop.f32.mrb[16].mxu1  ;;  %v1183_v3 = vld [vmem:[#allocation2 + $0xb8] sm:$0xff] }
 0x131   : > { %v557_v17 = vadd.f32 %v556_v8, %v2316_v15  ;;  %v558_v18 = vpop.f32.mrb[17].mxu0  ;;  %v2395_v20 = vadd.f32 %v652_v9, %v2316_v15  ;;  %v654_v23 = vpop.f32.mrb[17].mxu1  ;;  %1692 = vmatpush1.bf16.msra.mxu0 %v1691_v61 }
 0x132   : > { %v559_v24 = vadd.f32 %v558_v18, %v2320_v16  ;;  %945 = vmatprep.mubr.f32.mxu1 %v714_v7  ;;  %v2399_v25 = vadd.f32 %v654_v23, %v2320_v16  ;;  %1693 = vmatprep.subr.bf16.mxu0 %v1868_v30 }
 0x133   : > { %946 = vmatmul.mubr.f32.gmra.mrb[46].mxu1 %v713_v10  ;;  %v715_v34 = vmax.f32 %v557_v17, 0.0 }
 0x134   : > { %v716_v29 = vmax.f32 %v559_v24, 0.0  ;;  %v562_v31 = vpop.f32.mrb[18].mxu0  ;;  %v658_v33 = vpop.f32.mrb[18].mxu1  ;;  %v1694_v24 = vpack.c.bf16 %v1183_v3, %v1182_v1 }
 0x135   : > { %v563_v37 = vadd.f32 %v562_v31, %v2316_v15  ;;  %v564_v38 = vpop.f32.mrb[19].mxu0  ;;  %v2404_v40 = vadd.f32 %v658_v33, %v2316_v15  ;;  %v660_v41 = vpop.f32.mrb[19].mxu1 }
 0x136   : > { %v565_v42 = vadd.f32 %v564_v38, %v2320_v16  ;;  %951 = vmatprep.mubr.f32.mxu1 %v716_v29  ;;  %v2408_v43 = vadd.f32 %v660_v41, %v2320_v16  ;;  %1695 = vmatpush1.bf16.msra.mxu0 %v1694_v24 }
 0x137   : > { %952 = vmatmul.mubr.f32.gmra.mrb[48].mxu1 %v715_v34  ;;  %v717_v54 = vmax.f32 %v563_v37, 0.0  ;;  %1696 = vmatprep.subr.bf16.mxu0 %v1868_v30 }
 0x138   : > { %v718_v48 = vmax.f32 %v565_v42, 0.0  ;;  %v568_v50 = vpop.f32.mrb[20].mxu0  ;;  %v664_v53 = vpop.f32.mrb[20].mxu1 }
 0x139   : > { %v569_v55 = vadd.f32 %v568_v50, %v2316_v15  ;;  %v570_v56 = vpop.f32.mrb[21].mxu0  ;;  %v2413_v57 = vadd.f32 %v664_v53, %v2316_v15  ;;  %v666_v58 = vpop.f32.mrb[21].mxu1 }
 0x13a   : > { %v571_v59 = vadd.f32 %v570_v56, %v2320_v16  ;;  %957 = vmatprep.mubr.f32.mxu1 %v718_v48  ;;  %v2417_v60 = vadd.f32 %v666_v58, %v2320_v16  ;;  %v1187_v48 = vld [vmem:[#allocation2 + $0xd8] sm:$0xff]  ;;  %1698 = vmatpush1.bf16.msra.mxu0 %v1697_v45 }
 0x13b   : > { %958 = vmatmul.mubr.f32.gmra.mrb[50].mxu1 %v717_v54  ;;  %v719_v7 = vmax.f32 %v569_v55, 0.0  ;;  %1699 = vmatprep.subr.bf16.mxu0 %v1868_v30 }
 0x13c   : > { %v720_v0 = vmax.f32 %v571_v59, 0.0  ;;  %v574_v5 = vpop.f32.mrb[22].mxu0  ;;  %v670_v6 = vpop.f32.mrb[22].mxu1 }
 0x13d   : > { %v575_v8 = vadd.f32 %v574_v5, %v2316_v15  ;;  %v576_v9 = vpop.f32.mrb[23].mxu0  ;;  %v2422_v10 = vadd.f32 %v670_v6, %v2316_v15  ;;  %v672_v17 = vpop.f32.mrb[23].mxu1  ;;  %v1188_v5 = vld [vmem:[#allocation2 + $0xe0] sm:$0xff]  ;;  %v1189_v6 = vld [vmem:[#allocation2 + $0xe8] sm:$0xff] }
 0x13e   : > { %v577_v18 = vadd.f32 %v576_v9, %v2320_v16  ;;  %963 = vmatprep.mubr.f32.mxu1 %v720_v0  ;;  %v2426_v23 = vadd.f32 %v672_v17, %v2320_v16  ;;  %v1700_v0 = vpack.c.bf16 %v1187_v48, %v1186_v46 }
 0x13f   : > { %964 = vmatmul.mubr.f32.gmra.mrb[52].mxu1 %v719_v7  ;;  %v721_v33 = vmax.f32 %v575_v8, 0.0 }
 0x140   : > { %v722_v28 = vmax.f32 %v577_v18, 0.0  ;;  %v580_v29 = vpop.f32.mrb[24].mxu0  ;;  %v676_v31 = vpop.f32.mrb[24].mxu1  ;;  %1701 = vmatpush1.bf16.msra.mxu0 %v1700_v0  ;;  %v740_v0 = vmax.f32 %v2363_v19, 0.0  ;;  %v746_v19 = vmax.f32 %v2390_v4, 0.0  ;;  %v752_v4 = vmax.f32 %v2417_v60, 0.0 }
 0x141   : > { %v581_v34 = vadd.f32 %v580_v29, %v2316_v15  ;;  %v582_v37 = vpop.f32.mrb[25].mxu0  ;;  %v2431_v38 = vadd.f32 %v676_v31, %v2316_v15  ;;  %v678_v41 = vpop.f32.mrb[25].mxu1  ;;  %v1703_v31 = vpack.c.bf16 %v1189_v6, %v1188_v5  ;;  %1702 = vmatprep.subr.bf16.mxu0 %v1868_v30  ;;  %v1191_v5 = vld [vmem:[#allocation2 + $0xf8] sm:$0xff] }
 0x142   : > { %v583_v42 = vadd.f32 %v582_v37, %v2320_v16  ;;  %969 = vmatprep.mubr.f32.mxu1 %v722_v28  ;;  %v2435_v44 = vadd.f32 %v678_v41, %v2320_v16  ;;  %v607_v37 = vadd.f32 %v2326_v22, %v2320_v16 }
 0x143   : > { %970 = vmatmul.mubr.f32.gmra.mrb[54].mxu1 %v721_v33  ;;  %v723_v55 = vmax.f32 %v581_v34, 0.0  ;;  %v755_v60 = vmax.f32 %v2431_v38, 0.0  ;;  %v827_v38 = vld [vmem:[%s2703_s4] sm:$0x3] }
 0x144   : > { %v724_v50 = vmax.f32 %v583_v42, 0.0  ;;  %v586_v53 = vpop.f32.mrb[26].mxu0  ;;  %v682_v54 = vpop.f32.mrb[26].mxu1  ;;  %1704 = vmatpush1.bf16.msra.mxu0 %v1703_v31 }
 0x145   : > { %v587_v56 = vadd.f32 %v586_v53, %v2316_v15  ;;  %v588_v58 = vpop.f32.mrb[27].mxu0  ;;  %v2440_v59 = vadd.f32 %v682_v54, %v2316_v15  ;;  %v684_v61 = vpop.f32.mrb[27].mxu1  ;;  %1705 = vmatprep.subr.bf16.mxu0 %v1868_v30  ;;  %v735_v30 = vmax.f32 %v2341_v49, 0.0  ;;  %v1190_v49 = vld [vmem:[#allocation2 + $0xf0] sm:$0xff] }
 0x146   : > { %v589_v1 = vadd.f32 %v588_v58, %v2320_v16  ;;  %975 = vmatprep.mubr.f32.mxu1 %v724_v50  ;;  %v2444_v3 = vadd.f32 %v684_v61, %v2320_v16  ;;  %v734_v58 = vmax.f32 %v2336_v39, 0.0  ;;  %v736_v61 = vmax.f32 %v2345_v52, 0.0 }
 0x147   : > { %976 = vmatmul.mubr.f32.gmra.mrb[56].mxu1 %v723_v55  ;;  %v725_v17 = vmax.f32 %v587_v56, 0.0  ;;  %v732_v55 = vmax.f32 %v607_v37, 0.0  ;;  %v737_v39 = vmax.f32 %v2350_v62, 0.0  ;;  %v739_v52 = vmax.f32 %v2359_v13, 0.0 }
 0x148   : > { %v726_v7 = vmax.f32 %v589_v1, 0.0  ;;  %v592_v8 = vpop.f32.mrb[28].mxu0  ;;  %v688_v9 = vpop.f32.mrb[28].mxu1  ;;  %v738_v1 = vmax.f32 %v2354_v2, 0.0  ;;  %v741_v2 = vmax.f32 %v2368_v32, 0.0  ;;  %v1706_v6 = vpack.c.bf16 %v1191_v5, %v1190_v49 }
 0x149   : > { %v593_v18 = vadd.f32 %v592_v8, %v2316_v15  ;;  %v594_v24 = vpop.f32.mrb[29].mxu0  ;;  %v2449_v26 = vadd.f32 %v688_v9, %v2316_v15  ;;  %v690_v27 = vpop.f32.mrb[29].mxu1  ;;  %v743_v62 = vmax.f32 %v2377_v47, 0.0  ;;  %v745_v13 = vmax.f32 %v2386_v63, 0.0 }
 0x14a   : > { %v595_v28 = vadd.f32 %v594_v24, %v2320_v16  ;;  %981 = vmatprep.mubr.f32.mxu1 %v726_v7  ;;  %v2453_v29 = vadd.f32 %v690_v27, %v2320_v16  ;;  %1707 = vmatpush1.bf16.msra.mxu0 %v1706_v6  ;;  %v747_v32 = vmax.f32 %v2395_v20, 0.0  ;;  %v749_v7 = vmax.f32 %v2404_v40, 0.0 }
 0x14b   : > { %982 = vmatmul.mubr.f32.gmra.mrb[58].mxu1 %v725_v17  ;;  %v727_v42 = vmax.f32 %v593_v18, 0.0  ;;  %v754_v47 = vmax.f32 %v2426_v23, 0.0  ;;  %v756_v63 = vmax.f32 %v2435_v44, 0.0  ;;  %v758_v20 = vmax.f32 %v2444_v3, 0.0 }
 0x14c   : > { %v728_v33 = vmax.f32 %v595_v28, 0.0  ;;  %v598_v34 = vpop.f32.mrb[30].mxu0  ;;  %v694_v41 = vpop.f32.mrb[30].mxu1  ;;  %v760_v40 = vmax.f32 %v2453_v29, 0.0  ;;  %v757_v23 = vmax.f32 %v2440_v59, 0.0  ;;  %v759_v44 = vmax.f32 %v2449_v26, 0.0 }
 0x14d   : > { %v599_v45 = vadd.f32 %v598_v34, %v2316_v15  ;;  %v600_v46 = vpop.f32.mrb[31].mxu0  ;;  %v2460_v48 = vadd.f32 %v694_v41, %v2316_v15  ;;  %v696_v50 = vpop.f32.mrb[31].mxu1  ;;  %v731_v15 = vmax.f32 %v2324_v21, 0.0  ;;  %v742_v21 = vmax.f32 %v2372_v35, 0.0 }
 0x14e   : > { %v601_v53 = vadd.f32 %v600_v46, %v2320_v16  ;;  %987 = vmatprep.mubr.f32.mxu1 %v728_v33  ;;  %v2464_v54 = vadd.f32 %v696_v50, %v2320_v16  ;;  %v733_v16 = vmax.f32 %v2332_v36, 0.0  ;;  %v744_v36 = vmax.f32 %v2381_v51, 0.0 }
 0x14f   : > { %988 = vmatmul.mubr.f32.gmra.mrb[60].mxu1 %v727_v42  ;;  %v729_v56 = vmax.f32 %v599_v45, 0.0  ;;  %v748_v35 = vmax.f32 %v2399_v25, 0.0  ;;  %v750_v51 = vmax.f32 %v2408_v43, 0.0  ;;  %v751_v25 = vmax.f32 %v2413_v57, 0.0 }
 0x150   : > { %v730_v22 = vmax.f32 %v601_v53, 0.0  ;;  %v753_v43 = vmax.f32 %v2422_v10, 0.0  ;;  %v762_v57 = vmax.f32 %v2464_v54, 0.0  ;;  %v761_v10 = vmax.f32 %v2460_v48, 0.0 }
 0x151   : > { %v2503_v3 = vrot.slane %v827_v38, %v337_v12  ;;  %v2507_v59 = vrot.slane %v827_v38, %v341_v14 }
 0x152   : > { %993 = vmatprep.mubr.f32.mxu1 %v730_v22 }
 0x153   : > { %994 = vmatmul.mubr.f32.gmra.mrb[62].mxu1 %v729_v56 }
 0x154   : > { %999 = vmatprep.mubr.f32.mxu1 %v732_v55 }
 0x157   : > { %1000 = vmatmul.mubr.f32.gmra.mrb[64].mxu1 %v731_v15 }
 0x158   : > { %1005 = vmatprep.mubr.f32.mxu1 %v734_v58 }
 0x15b   : > { %1006 = vmatmul.mubr.f32.gmra.mrb[66].mxu1 %v733_v16 }
 0x15c   : > { %1011 = vmatprep.mubr.f32.mxu1 %v736_v61 }
 0x15f   : > { %1012 = vmatmul.mubr.f32.gmra.mrb[68].mxu1 %v735_v30 }
 0x160   : > { %1017 = vmatprep.mubr.f32.mxu1 %v738_v1 }
 0x163   : > { %1018 = vmatmul.mubr.f32.gmra.mrb[70].mxu1 %v737_v39 }
 0x164   : > { %1023 = vmatprep.mubr.f32.mxu1 %v740_v0 }
 0x167   : > { %1024 = vmatmul.mubr.f32.gmra.mrb[72].mxu1 %v739_v52 }
 0x168   : > { %1029 = vmatprep.mubr.f32.mxu1 %v742_v21 }
 0x16b   : > { %1030 = vmatmul.mubr.f32.gmra.mrb[74].mxu1 %v741_v2 }
 0x16c   : > { %1035 = vmatprep.mubr.f32.mxu1 %v744_v36 }
 0x16f   : > { %1036 = vmatmul.mubr.f32.gmra.mrb[76].mxu1 %v743_v62 }
 0x170   : > { %1041 = vmatprep.mubr.f32.mxu1 %v746_v19 }
 0x173   : > { %1042 = vmatmul.mubr.f32.gmra.mrb[78].mxu1 %v745_v13 }
 0x174   : > { %1047 = vmatprep.mubr.f32.mxu1 %v748_v35 }
 0x177   : > { %1048 = vmatmul.mubr.f32.gmra.mrb[80].mxu1 %v747_v32 }
 0x178   : > { %1053 = vmatprep.mubr.f32.mxu1 %v750_v51 }
 0x17b   : > { %1054 = vmatmul.mubr.f32.gmra.mrb[82].mxu1 %v749_v7 }
 0x17c   : > { %1059 = vmatprep.mubr.f32.mxu1 %v752_v4 }
 0x17f   : > { %1060 = vmatmul.mubr.f32.gmra.mrb[84].mxu1 %v751_v25 }
 0x180   : > { %1065 = vmatprep.mubr.f32.mxu1 %v754_v47 }
 0x183   : > { %1066 = vmatmul.mubr.f32.gmra.mrb[86].mxu1 %v753_v43 }
 0x184   : > { %1071 = vmatprep.mubr.f32.mxu1 %v756_v63 }
 0x187   : > { %1072 = vmatmul.mubr.f32.gmra.mrb[88].mxu1 %v755_v60 }
 0x188   : > { %1077 = vmatprep.mubr.f32.mxu1 %v758_v20 }
 0x18b   : > { %1078 = vmatmul.mubr.f32.gmra.mrb[90].mxu1 %v757_v23 }
 0x18c   : > { %1083 = vmatprep.mubr.f32.mxu1 %v760_v40 }
 0x18f   : > { %1084 = vmatmul.mubr.f32.gmra.mrb[92].mxu1 %v759_v44 }
 0x190   : > { %1089 = vmatprep.mubr.f32.mxu1 %v762_v57 }
 0x193   : > { %1090 = vmatmul.mubr.f32.gmra.mrb[94].mxu1 %v761_v10 }
 0x1ea   : > { %v905_v8 = vpop.f32.mrb[32].mxu1 }
 0x1eb   : > { %v906_v9 = vadd.f32 %v905_v8, %v2503_v3  ;;  %v907_v17 = vpop.f32.mrb[33].mxu1 }
 0x1ec   : > { %v908_v18 = vadd.f32 %v907_v17, %v2507_v59 }
 0x1ed   : > { %v1096_v27 = vmax.f32 %v906_v9, 0.0 }
 0x1ee   : > { %v1097_v24 = vmax.f32 %v908_v18, 0.0  ;;  %v911_v26 = vpop.f32.mrb[34].mxu1 }
 0x1ef   : > { %v912_v28 = vadd.f32 %v911_v26, %v2503_v3  ;;  %v913_v29 = vpop.f32.mrb[35].mxu1 }
 0x1f0   : > { %v914_v31 = vadd.f32 %v913_v29, %v2507_v59  ;;  %1263 = vmatprep.mubr.f32.mxu0 %v1097_v24 }
 0x1f1   : > { %1264 = vmatmul.mubr.f32.vlgmr.msra.gmra.mrb[32].mxu0 %v1096_v27  ;;  %v1098_v14 = vmax.f32 %v912_v28, 0.0 }
 0x1f2   : > { %v1099_v12 = vmax.f32 %v914_v31, 0.0  ;;  %v917_v11 = vpop.f32.mrb[36].mxu1 }
 0x1f3   : > { %v918_v33 = vadd.f32 %v917_v11, %v2503_v3  ;;  %v919_v34 = vpop.f32.mrb[37].mxu1 }
 0x1f4   : > { %v920_v37 = vadd.f32 %v919_v34, %v2507_v59  ;;  %1268 = vmatprep.mubr.f32.mxu0 %v1099_v12 }
 0x1f5   : > { %1269 = vmatmul.mubr.f32.gmra.mrb[34].mxu0 %v1098_v14  ;;  %v1100_v45 = vmax.f32 %v918_v33, 0.0 }
 0x1f6   : > { %v1101_v41 = vmax.f32 %v920_v37, 0.0  ;;  %v923_v42 = vpop.f32.mrb[38].mxu1 }
 0x1f7   : > { %v924_v46 = vadd.f32 %v923_v42, %v2503_v3  ;;  %v925_v48 = vpop.f32.mrb[39].mxu1 }
 0x1f8   : > { %v926_v50 = vadd.f32 %v925_v48, %v2507_v59  ;;  %1273 = vmatprep.mubr.f32.mxu0 %v1101_v41 }
 0x1f9   : > { %1274 = vmatmul.mubr.f32.gmra.mrb[36].mxu0 %v1100_v45  ;;  %v1102_v22 = vmax.f32 %v924_v46, 0.0 }
 0x1fa   : > { %v1103_v53 = vmax.f32 %v926_v50, 0.0  ;;  %v929_v54 = vpop.f32.mrb[40].mxu1 }
 0x1fb   : > { %v930_v55 = vadd.f32 %v929_v54, %v2503_v3  ;;  %v931_v56 = vpop.f32.mrb[41].mxu1 }
 0x1fc   : > { %v932_v58 = vadd.f32 %v931_v56, %v2507_v59  ;;  %1278 = vmatprep.mubr.f32.mxu0 %v1103_v53 }
 0x1fd   : > { %1279 = vmatmul.mubr.f32.gmra.mrb[38].mxu0 %v1102_v22  ;;  %v1104_v16 = vmax.f32 %v930_v55, 0.0 }
 0x1fe   : > { %v1105_v15 = vmax.f32 %v932_v58, 0.0  ;;  %v935_v61 = vpop.f32.mrb[42].mxu1 }
 0x1ff   : > { %v936_v1 = vadd.f32 %v935_v61, %v2503_v3  ;;  %v937_v30 = vpop.f32.mrb[43].mxu1 }
 0x200   : > { %v938_v0 = vadd.f32 %v937_v30, %v2507_v59  ;;  %1283 = vmatprep.mubr.f32.mxu0 %v1105_v15 }
 0x201   : > { %1284 = vmatmul.mubr.f32.gmra.mrb[40].mxu0 %v1104_v16  ;;  %v1106_v52 = vmax.f32 %v936_v1, 0.0 }
 0x202   : > { %v1107_v39 = vmax.f32 %v938_v0, 0.0  ;;  %v941_v21 = vpop.f32.mrb[44].mxu1 }
 0x203   : > { %v942_v36 = vadd.f32 %v941_v21, %v2503_v3  ;;  %v943_v2 = vpop.f32.mrb[45].mxu1 }
 0x204   : > { %v944_v49 = vadd.f32 %v943_v2, %v2507_v59  ;;  %1288 = vmatprep.mubr.f32.mxu0 %v1107_v39 }
 0x205   : > { %1289 = vmatmul.mubr.f32.gmra.mrb[42].mxu0 %v1106_v52  ;;  %v1108_v6 = vmax.f32 %v942_v36, 0.0 }
 0x206   : > { %v1109_v5 = vmax.f32 %v944_v49, 0.0  ;;  %v947_v19 = vpop.f32.mrb[46].mxu1 }
 0x207   : > { %v948_v62 = vadd.f32 %v947_v19, %v2503_v3  ;;  %v949_v35 = vpop.f32.mrb[47].mxu1 }
 0x208   : > { %v950_v13 = vadd.f32 %v949_v35, %v2507_v59  ;;  %1293 = vmatprep.mubr.f32.mxu0 %v1109_v5 }
 0x209   : > { %1294 = vmatmul.mubr.f32.gmra.mrb[44].mxu0 %v1108_v6  ;;  %v1110_v4 = vmax.f32 %v948_v62, 0.0 }
 0x20a   : > { %v1111_v51 = vmax.f32 %v950_v13, 0.0  ;;  %v953_v32 = vpop.f32.mrb[48].mxu1 }
 0x20b   : > { %v954_v7 = vadd.f32 %v953_v32, %v2503_v3  ;;  %v955_v47 = vpop.f32.mrb[49].mxu1 }
 0x20c   : > { %v956_v25 = vadd.f32 %v955_v47, %v2507_v59  ;;  %1298 = vmatprep.mubr.f32.mxu0 %v1111_v51 }
 0x20d   : > { %1299 = vmatmul.mubr.f32.gmra.mrb[46].mxu0 %v1110_v4  ;;  %v1112_v20 = vmax.f32 %v954_v7, 0.0 }
 0x20e   : > { %v1113_v63 = vmax.f32 %v956_v25, 0.0  ;;  %v959_v43 = vpop.f32.mrb[50].mxu1 }
 0x20f   : > { %v960_v60 = vadd.f32 %v959_v43, %v2503_v3  ;;  %v961_v40 = vpop.f32.mrb[51].mxu1 }
 0x210   : > { %v962_v23 = vadd.f32 %v961_v40, %v2507_v59  ;;  %1303 = vmatprep.mubr.f32.mxu0 %v1113_v63 }
 0x211   : > { %1304 = vmatmul.mubr.f32.gmra.mrb[48].mxu0 %v1112_v20  ;;  %v1114_v10 = vmax.f32 %v960_v60, 0.0 }
 0x212   : > { %v1115_v57 = vmax.f32 %v962_v23, 0.0  ;;  %v965_v44 = vpop.f32.mrb[52].mxu1 }
 0x213   : > { %v966_v38 = vadd.f32 %v965_v44, %v2503_v3  ;;  %v967_v8 = vpop.f32.mrb[53].mxu1 }
 0x214   : > { %v968_v9 = vadd.f32 %v967_v8, %v2507_v59  ;;  %1308 = vmatprep.mubr.f32.mxu0 %v1115_v57 }
 0x215   : > { %1309 = vmatmul.mubr.f32.gmra.mrb[50].mxu0 %v1114_v10  ;;  %v1116_v24 = vmax.f32 %v966_v38, 0.0 }
 0x216   : > { %v1117_v17 = vmax.f32 %v968_v9, 0.0  ;;  %v971_v18 = vpop.f32.mrb[54].mxu1 }
 0x217   : > { %v972_v26 = vadd.f32 %v971_v18, %v2503_v3  ;;  %v973_v27 = vpop.f32.mrb[55].mxu1 }
 0x218   : > { %v974_v28 = vadd.f32 %v973_v27, %v2507_v59  ;;  %1313 = vmatprep.mubr.f32.mxu0 %v1117_v17 }
 0x219   : > { %1314 = vmatmul.mubr.f32.gmra.mrb[52].mxu0 %v1116_v24  ;;  %v1118_v12 = vmax.f32 %v972_v26, 0.0 }
 0x21a   : > { %v1119_v29 = vmax.f32 %v974_v28, 0.0  ;;  %v977_v31 = vpop.f32.mrb[56].mxu1 }
 0x21b   : > { %v978_v11 = vadd.f32 %v977_v31, %v2503_v3  ;;  %v979_v14 = vpop.f32.mrb[57].mxu1 }
 0x21c   : > { %v980_v33 = vadd.f32 %v979_v14, %v2507_v59  ;;  %1318 = vmatprep.mubr.f32.mxu0 %v1119_v29 }
 0x21d   : > { %1319 = vmatmul.mubr.f32.gmra.mrb[54].mxu0 %v1118_v12  ;;  %v1120_v41 = vmax.f32 %v978_v11, 0.0 }
 0x21e   : > { %v1121_v34 = vmax.f32 %v980_v33, 0.0  ;;  %v983_v37 = vpop.f32.mrb[58].mxu1 }
 0x21f   : > { %v984_v42 = vadd.f32 %v983_v37, %v2503_v3  ;;  %v985_v45 = vpop.f32.mrb[59].mxu1 }
 0x220   : > { %v986_v46 = vadd.f32 %v985_v45, %v2507_v59  ;;  %1323 = vmatprep.mubr.f32.mxu0 %v1121_v34 }
 0x221   : > { %1324 = vmatmul.mubr.f32.gmra.mrb[56].mxu0 %v1120_v41  ;;  %v1122_v53 = vmax.f32 %v984_v42, 0.0 }
 0x222   : > { %v1123_v48 = vmax.f32 %v986_v46, 0.0  ;;  %v989_v50 = vpop.f32.mrb[60].mxu1 }
 0x223   : > { %v990_v54 = vadd.f32 %v989_v50, %v2503_v3  ;;  %v991_v22 = vpop.f32.mrb[61].mxu1 }
 0x224   : > { %v992_v55 = vadd.f32 %v991_v22, %v2507_v59  ;;  %1328 = vmatprep.mubr.f32.mxu0 %v1123_v48 }
 0x225   : > { %1329 = vmatmul.mubr.f32.gmra.mrb[58].mxu0 %v1122_v53  ;;  %v1124_v15 = vmax.f32 %v990_v54, 0.0 }
 0x226   : > { %v1125_v56 = vmax.f32 %v992_v55, 0.0  ;;  %v995_v58 = vpop.f32.mrb[62].mxu1 }
 0x227   : > { %v996_v61 = vadd.f32 %v995_v58, %v2503_v3  ;;  %v997_v16 = vpop.f32.mrb[63].mxu1 }
 0x228   : > { %v998_v1 = vadd.f32 %v997_v16, %v2507_v59  ;;  %1333 = vmatprep.mubr.f32.mxu0 %v1125_v56 }
 0x229   : > { %1334 = vmatmul.mubr.f32.gmra.mrb[60].mxu0 %v1124_v15  ;;  %v1126_v39 = vmax.f32 %v996_v61, 0.0 }
 0x22a   : > { %v1127_v30 = vmax.f32 %v998_v1, 0.0  ;;  %v1001_v0 = vpop.f32.mrb[64].mxu1 }
 0x22b   : > { %v1002_v21 = vadd.f32 %v1001_v0, %v2503_v3  ;;  %v1003_v52 = vpop.f32.mrb[65].mxu1 }
 0x22c   : > { %v1004_v36 = vadd.f32 %v1003_v52, %v2507_v59  ;;  %1338 = vmatprep.mubr.f32.mxu0 %v1127_v30 }
 0x22d   : > { %1339 = vmatmul.mubr.f32.gmra.mrb[62].mxu0 %v1126_v39  ;;  %v1128_v5 = vmax.f32 %v1002_v21, 0.0 }
 0x22e   : > { %v1129_v2 = vmax.f32 %v1004_v36, 0.0  ;;  %v1007_v49 = vpop.f32.mrb[66].mxu1 }
 0x22f   : > { %v1008_v19 = vadd.f32 %v1007_v49, %v2503_v3  ;;  %v1009_v6 = vpop.f32.mrb[67].mxu1 }
 0x230   : > { %v1010_v62 = vadd.f32 %v1009_v6, %v2507_v59  ;;  %1343 = vmatprep.mubr.f32.mxu0 %v1129_v2 }
 0x231   : > { %1344 = vmatmul.mubr.f32.gmra.mrb[64].mxu0 %v1128_v5  ;;  %v1130_v51 = vmax.f32 %v1008_v19, 0.0 }
 0x232   : > { %v1131_v35 = vmax.f32 %v1010_v62, 0.0  ;;  %v1013_v13 = vpop.f32.mrb[68].mxu1 }
 0x233   : > { %v1014_v32 = vadd.f32 %v1013_v13, %v2503_v3  ;;  %v1015_v4 = vpop.f32.mrb[69].mxu1 }
 0x234   : > { %v1016_v7 = vadd.f32 %v1015_v4, %v2507_v59  ;;  %1348 = vmatprep.mubr.f32.mxu0 %v1131_v35 }
 0x235   : > { %1349 = vmatmul.mubr.f32.gmra.mrb[66].mxu0 %v1130_v51  ;;  %v1132_v63 = vmax.f32 %v1014_v32, 0.0 }
 0x236   : > { %v1133_v47 = vmax.f32 %v1016_v7, 0.0  ;;  %v1019_v25 = vpop.f32.mrb[70].mxu1 }
 0x237   : > { %v1020_v43 = vadd.f32 %v1019_v25, %v2503_v3  ;;  %v1021_v20 = vpop.f32.mrb[71].mxu1 }
 0x238   : > { %v1022_v60 = vadd.f32 %v1021_v20, %v2507_v59  ;;  %1353 = vmatprep.mubr.f32.mxu0 %v1133_v47 }
 0x239   : > { %1354 = vmatmul.mubr.f32.gmra.mrb[68].mxu0 %v1132_v63  ;;  %v1134_v57 = vmax.f32 %v1020_v43, 0.0 }
 0x23a   : > { %v1135_v40 = vmax.f32 %v1022_v60, 0.0  ;;  %v1025_v23 = vpop.f32.mrb[72].mxu1 }
 0x23b   : > { %v1026_v44 = vadd.f32 %v1025_v23, %v2503_v3  ;;  %v1027_v10 = vpop.f32.mrb[73].mxu1 }
 0x23c   : > { %v1028_v38 = vadd.f32 %v1027_v10, %v2507_v59  ;;  %1358 = vmatprep.mubr.f32.mxu0 %v1135_v40 }
 0x23d   : > { %1359 = vmatmul.mubr.f32.gmra.mrb[70].mxu0 %v1134_v57  ;;  %v1136_v17 = vmax.f32 %v1026_v44, 0.0 }
 0x23e   : > { %v1137_v8 = vmax.f32 %v1028_v38, 0.0  ;;  %v1031_v9 = vpop.f32.mrb[74].mxu1 }
 0x23f   : > { %v1032_v18 = vadd.f32 %v1031_v9, %v2503_v3  ;;  %v1033_v24 = vpop.f32.mrb[75].mxu1 }
 0x240   : > { %v1034_v26 = vadd.f32 %v1033_v24, %v2507_v59  ;;  %1363 = vmatprep.mubr.f32.mxu0 %v1137_v8 }
 0x241   : > { %1364 = vmatmul.mubr.f32.gmra.mrb[72].mxu0 %v1136_v17  ;;  %v1138_v29 = vmax.f32 %v1032_v18, 0.0 }
 0x242   : > { %v1139_v27 = vmax.f32 %v1034_v26, 0.0  ;;  %v1037_v28 = vpop.f32.mrb[76].mxu1 }
 0x243   : > { %v1038_v31 = vadd.f32 %v1037_v28, %v2503_v3  ;;  %v1039_v12 = vpop.f32.mrb[77].mxu1 }
 0x244   : > { %v1040_v11 = vadd.f32 %v1039_v12, %v2507_v59  ;;  %1368 = vmatprep.mubr.f32.mxu0 %v1139_v27  ;;  %v2579_v27 = vld [vmem:[%s2705_s6] ss:$0 sm:$0xff] }
 0x245   : > { %1369 = vmatmul.mubr.f32.gmra.mrb[74].mxu0 %v1138_v29  ;;  %v1140_v34 = vmax.f32 %v1038_v31, 0.0 }
 0x246   : > { %v1141_v14 = vmax.f32 %v1040_v11, 0.0  ;;  %v1043_v33 = vpop.f32.mrb[78].mxu1 }
 0x247   : > { %v1044_v37 = vadd.f32 %v1043_v33, %v2503_v3  ;;  %v1045_v41 = vpop.f32.mrb[79].mxu1 }
 0x248   : > { %v1046_v42 = vadd.f32 %v1045_v41, %v2507_v59  ;;  %1373 = vmatprep.mubr.f32.mxu0 %v1141_v14 }
 0x249   : > { %1374 = vmatmul.mubr.f32.gmra.mrb[76].mxu0 %v1140_v34  ;;  %v1142_v48 = vmax.f32 %v1044_v37, 0.0 }
 0x24a   : > { %v1143_v45 = vmax.f32 %v1046_v42, 0.0  ;;  %v1049_v46 = vpop.f32.mrb[80].mxu1 }
 0x24b   : > { %v1050_v50 = vadd.f32 %v1049_v46, %v2503_v3  ;;  %v1051_v53 = vpop.f32.mrb[81].mxu1 }
 0x24c   : > { %v1052_v54 = vadd.f32 %v1051_v53, %v2507_v59  ;;  %1378 = vmatprep.mubr.f32.mxu0 %v1143_v45 }
 0x24d   : > { %1379 = vmatmul.mubr.f32.gmra.mrb[78].mxu0 %v1142_v48  ;;  %v1144_v56 = vmax.f32 %v1050_v50, 0.0 }
 0x24e   : > { %v1145_v22 = vmax.f32 %v1052_v54, 0.0  ;;  %v1055_v55 = vpop.f32.mrb[82].mxu1 }
 0x24f   : > { %v1056_v58 = vadd.f32 %v1055_v55, %v2503_v3  ;;  %v1057_v15 = vpop.f32.mrb[83].mxu1 }
 0x250   : > { %v1058_v61 = vadd.f32 %v1057_v15, %v2507_v59  ;;  %1383 = vmatprep.mubr.f32.mxu0 %v1145_v22 }
 0x251   : > { %1384 = vmatmul.mubr.f32.gmra.mrb[80].mxu0 %v1144_v56  ;;  %v1146_v30 = vmax.f32 %v1056_v58, 0.0 }
 0x252   : > { %v1147_v16 = vmax.f32 %v1058_v61, 0.0  ;;  %v1061_v1 = vpop.f32.mrb[84].mxu1 }
 0x253   : > { %v1062_v0 = vadd.f32 %v1061_v1, %v2503_v3  ;;  %v1063_v39 = vpop.f32.mrb[85].mxu1 }
 0x254   : > { %v1064_v21 = vadd.f32 %v1063_v39, %v2507_v59  ;;  %1388 = vmatprep.mubr.f32.mxu0 %v1147_v16 }
 0x255   : > { %1389 = vmatmul.mubr.f32.gmra.mrb[82].mxu0 %v1146_v30  ;;  %v1148_v2 = vmax.f32 %v1062_v0, 0.0 }
 0x256   : > { %v1149_v52 = vmax.f32 %v1064_v21, 0.0  ;;  %v1067_v36 = vpop.f32.mrb[86].mxu1 }
 0x257   : > { %v1068_v49 = vadd.f32 %v1067_v36, %v2503_v3  ;;  %v1069_v5 = vpop.f32.mrb[87].mxu1 }
 0x258   : > { %v1070_v19 = vadd.f32 %v1069_v5, %v2507_v59  ;;  %1393 = vmatprep.mubr.f32.mxu0 %v1149_v52 }
 0x259   : > { %1394 = vmatmul.mubr.f32.gmra.mrb[84].mxu0 %v1148_v2  ;;  %v1150_v35 = vmax.f32 %v1068_v49, 0.0 }
 0x25a   : > { %v1151_v6 = vmax.f32 %v1070_v19, 0.0  ;;  %v1073_v62 = vpop.f32.mrb[88].mxu1 }
 0x25b   : > { %v1074_v13 = vadd.f32 %v1073_v62, %v2503_v3  ;;  %v1075_v51 = vpop.f32.mrb[89].mxu1 }
 0x25c   : > { %v1076_v32 = vadd.f32 %v1075_v51, %v2507_v59  ;;  %1398 = vmatprep.mubr.f32.mxu0 %v1151_v6 }
 0x25d   : > { %1399 = vmatmul.mubr.f32.gmra.mrb[86].mxu0 %v1150_v35  ;;  %v1152_v47 = vmax.f32 %v1074_v13, 0.0 }
 0x25e   : > { %v1153_v4 = vmax.f32 %v1076_v32, 0.0  ;;  %v1079_v7 = vpop.f32.mrb[90].mxu1 }
 0x25f   : > { %v1080_v25 = vadd.f32 %v1079_v7, %v2503_v3  ;;  %v1081_v63 = vpop.f32.mrb[91].mxu1 }
 0x260   : > { %v1082_v43 = vadd.f32 %v1081_v63, %v2507_v59  ;;  %1403 = vmatprep.mubr.f32.mxu0 %v1153_v4 }
 0x261   : > { %1404 = vmatmul.mubr.f32.gmra.mrb[88].mxu0 %v1152_v47  ;;  %v1154_v40 = vmax.f32 %v1080_v25, 0.0 }
 0x262   : > { %v1155_v20 = vmax.f32 %v1082_v43, 0.0  ;;  %v1085_v60 = vpop.f32.mrb[92].mxu1 }
 0x263   : > { %v1086_v23 = vadd.f32 %v1085_v60, %v2503_v3  ;;  %v1087_v57 = vpop.f32.mrb[93].mxu1 }
 0x264   : > { %v1088_v44 = vadd.f32 %v1087_v57, %v2507_v59  ;;  %1408 = vmatprep.mubr.f32.mxu0 %v1155_v20 }
 0x265   : > { %1409 = vmatmul.mubr.f32.gmra.mrb[90].mxu0 %v1154_v40  ;;  %v1156_v8 = vmax.f32 %v1086_v23, 0.0 }
 0x266   : > { %v1157_v10 = vmax.f32 %v1088_v44, 0.0  ;;  %v1091_v38 = vpop.f32.mrb[94].mxu1 }
 0x267   : > { %v1092_v9 = vadd.f32 %v1091_v38, %v2503_v3  ;;  %v1093_v17 = vpop.f32.mrb[95].mxu1 }
 0x268   : > { %v1094_v18 = vadd.f32 %v1093_v17, %v2507_v59  ;;  %1413 = vmatprep.mubr.f32.mxu0 %v1157_v10 }
 0x269   : > { %1414 = vmatmul.mubr.f32.gmra.mrb[92].mxu0 %v1156_v8  ;;  %v1158_v26 = vmax.f32 %v1092_v9, 0.0 }
 0x26a   : > { %v1159_v24 = vmax.f32 %v1094_v18, 0.0 }
 0x26c   : > { %1418 = vmatprep.mubr.f32.mxu0 %v1159_v24 }
 0x26d   : > { %1419 = vmatmul.mubr.f32.gmra.mrb[94].mxu0 %v1158_v26 }
 0x2c4   : > { %v1265_v28 = vpop.f32.mrb[32].mxu0 }
 0x2c5   : > { %v1266_v3 = vadd.f32 %v2579_v27, %v1265_v28  ;;  %v1267_v29 = vpop.f32.mrb[33].mxu0 }
 0x2c7   : > { %1424 = vst [vmem:[%s2582_s22] sm:$0xff] %v1266_v3 }
 0x2c8   : > { %v1270_v59 = vpop.f32.mrb[34].mxu0 }
 0x2c9   : > { %v1271_v31 = vadd.f32 %v2579_v27, %v1270_v59  ;;  %v1272_v12 = vpop.f32.mrb[35].mxu0 }
 0x2cb   : > { %1425 = vst [vmem:[%s2582_s22 + $0x8] sm:$0xff] %v1271_v31 }
 0x2cc   : > { %v1275_v11 = vpop.f32.mrb[36].mxu0 }
 0x2cd   : > { %v1276_v14 = vadd.f32 %v2579_v27, %v1275_v11  ;;  %v1277_v33 = vpop.f32.mrb[37].mxu0 }
 0x2cf   : > { %1426 = vst [vmem:[%s2582_s22 + $0x10] sm:$0xff] %v1276_v14 }
 0x2d0   : > { %v1280_v34 = vpop.f32.mrb[38].mxu0 }
 0x2d1   : > { %v1281_v37 = vadd.f32 %v2579_v27, %v1280_v34  ;;  %v1282_v41 = vpop.f32.mrb[39].mxu0 }
 0x2d3   : > { %1427 = vst [vmem:[%s2582_s22 + $0x18] sm:$0xff] %v1281_v37 }
 0x2d4   : > { %v1285_v42 = vpop.f32.mrb[40].mxu0 }
 0x2d5   : > { %v1286_v45 = vadd.f32 %v2579_v27, %v1285_v42  ;;  %v1287_v46 = vpop.f32.mrb[41].mxu0 }
 0x2d7   : > { %1428 = vst [vmem:[%s2582_s22 + $0x20] sm:$0xff] %v1286_v45 }
 0x2d8   : > { %v1290_v48 = vpop.f32.mrb[42].mxu0 }
 0x2d9   : > { %v1291_v50 = vadd.f32 %v2579_v27, %v1290_v48  ;;  %v1292_v53 = vpop.f32.mrb[43].mxu0 }
 0x2db   : > { %1429 = vst [vmem:[%s2582_s22 + $0x28] sm:$0xff] %v1291_v50 }
 0x2dc   : > { %v1295_v54 = vpop.f32.mrb[44].mxu0 }
 0x2dd   : > { %v1296_v22 = vadd.f32 %v2579_v27, %v1295_v54  ;;  %v1297_v55 = vpop.f32.mrb[45].mxu0 }
 0x2df   : > { %1430 = vst [vmem:[%s2582_s22 + $0x30] sm:$0xff] %v1296_v22 }
 0x2e0   : > { %v1300_v56 = vpop.f32.mrb[46].mxu0 }
 0x2e1   : > { %v1301_v58 = vadd.f32 %v2579_v27, %v1300_v56  ;;  %v1302_v15 = vpop.f32.mrb[47].mxu0 }
 0x2e3   : > { %1431 = vst [vmem:[%s2582_s22 + $0x38] sm:$0xff] %v1301_v58 }
 0x2e4   : > { %v1305_v61 = vpop.f32.mrb[48].mxu0 }
 0x2e5   : > { %v1306_v16 = vadd.f32 %v2579_v27, %v1305_v61  ;;  %v1307_v1 = vpop.f32.mrb[49].mxu0 }
 0x2e7   : > { %1432 = vst [vmem:[%s2582_s22 + $0x40] sm:$0xff] %v1306_v16 }
 0x2e8   : > { %v1310_v30 = vpop.f32.mrb[50].mxu0 }
 0x2e9   : > { %v1311_v0 = vadd.f32 %v2579_v27, %v1310_v30  ;;  %v1312_v39 = vpop.f32.mrb[51].mxu0 }
 0x2eb   : > { %1433 = vst [vmem:[%s2582_s22 + $0x48] sm:$0xff] %v1311_v0 }
 0x2ec   : > { %v1315_v21 = vpop.f32.mrb[52].mxu0 }
 0x2ed   : > { %v1316_v52 = vadd.f32 %v2579_v27, %v1315_v21  ;;  %v1317_v36 = vpop.f32.mrb[53].mxu0 }
 0x2ef   : > { %1434 = vst [vmem:[%s2582_s22 + $0x50] sm:$0xff] %v1316_v52 }
 0x2f0   : > { %v1320_v2 = vpop.f32.mrb[54].mxu0 }
 0x2f1   : > { %v1321_v49 = vadd.f32 %v2579_v27, %v1320_v2  ;;  %v1322_v5 = vpop.f32.mrb[55].mxu0 }
 0x2f3   : > { %1435 = vst [vmem:[%s2582_s22 + $0x58] sm:$0xff] %v1321_v49 }
 0x2f4   : > { %v1325_v19 = vpop.f32.mrb[56].mxu0 }
 0x2f5   : > { %v1326_v6 = vadd.f32 %v2579_v27, %v1325_v19  ;;  %v1327_v62 = vpop.f32.mrb[57].mxu0 }
 0x2f7   : > { %1436 = vst [vmem:[%s2582_s22 + $0x60] sm:$0xff] %v1326_v6 }
 0x2f8   : > { %v1330_v35 = vpop.f32.mrb[58].mxu0 }
 0x2f9   : > { %v1331_v13 = vadd.f32 %v2579_v27, %v1330_v35  ;;  %v1332_v51 = vpop.f32.mrb[59].mxu0 }
 0x2fb   : > { %1437 = vst [vmem:[%s2582_s22 + $0x68] sm:$0xff] %v1331_v13 }
 0x2fc   : > { %v1335_v32 = vpop.f32.mrb[60].mxu0 }
 0x2fd   : > { %v1336_v4 = vadd.f32 %v2579_v27, %v1335_v32  ;;  %v1337_v7 = vpop.f32.mrb[61].mxu0 }
 0x2ff   : > { %1438 = vst [vmem:[%s2582_s22 + $0x70] sm:$0xff] %v1336_v4 }
 0x300   : > { %v1340_v47 = vpop.f32.mrb[62].mxu0 }
 0x301   : > { %v1341_v25 = vadd.f32 %v2579_v27, %v1340_v47  ;;  %v1342_v63 = vpop.f32.mrb[63].mxu0 }
 0x303   : > { %1439 = vst [vmem:[%s2582_s22 + $0x78] sm:$0xff] %v1341_v25 }
 0x304   : > { %v1345_v43 = vpop.f32.mrb[64].mxu0 }
 0x305   : > { %v1346_v20 = vadd.f32 %v2579_v27, %v1345_v43  ;;  %v1347_v60 = vpop.f32.mrb[65].mxu0 }
 0x307   : > { %1440 = vst [vmem:[%s2582_s22 + $0x80] sm:$0xff] %v1346_v20 }
 0x308   : > { %v1350_v40 = vpop.f32.mrb[66].mxu0 }
 0x309   : > { %v1351_v23 = vadd.f32 %v2579_v27, %v1350_v40  ;;  %v1352_v57 = vpop.f32.mrb[67].mxu0 }
 0x30b   : > { %1441 = vst [vmem:[%s2582_s22 + $0x88] sm:$0xff] %v1351_v23 }
 0x30c   : > { %v1355_v44 = vpop.f32.mrb[68].mxu0 }
 0x30d   : > { %v1356_v10 = vadd.f32 %v2579_v27, %v1355_v44  ;;  %v1357_v38 = vpop.f32.mrb[69].mxu0 }
 0x30f   : > { %1442 = vst [vmem:[%s2582_s22 + $0x90] sm:$0xff] %v1356_v10 }
 0x310   : > { %v1360_v8 = vpop.f32.mrb[70].mxu0 }
 0x311   : > { %v1361_v9 = vadd.f32 %v2579_v27, %v1360_v8  ;;  %v1362_v17 = vpop.f32.mrb[71].mxu0 }
 0x313   : > { %1443 = vst [vmem:[%s2582_s22 + $0x98] sm:$0xff] %v1361_v9 }
 0x314   : > { %v1365_v18 = vpop.f32.mrb[72].mxu0 }
 0x315   : > { %v1366_v24 = vadd.f32 %v2579_v27, %v1365_v18  ;;  %v1367_v26 = vpop.f32.mrb[73].mxu0 }
 0x317   : > { %1444 = vst [vmem:[%s2582_s22 + $0xa0] sm:$0xff] %v1366_v24 }
 0x318   : > { %v1370_v28 = vpop.f32.mrb[74].mxu0 }
 0x319   : > { %v1371_v3 = vadd.f32 %v2579_v27, %v1370_v28  ;;  %v1372_v29 = vpop.f32.mrb[75].mxu0 }
 0x31b   : > { %1445 = vst [vmem:[%s2582_s22 + $0xa8] sm:$0xff] %v1371_v3 }
 0x31c   : > { %v1375_v59 = vpop.f32.mrb[76].mxu0 }
 0x31d   : > { %v1376_v31 = vadd.f32 %v2579_v27, %v1375_v59  ;;  %v1377_v12 = vpop.f32.mrb[77].mxu0 }
 0x31f   : > { %1446 = vst [vmem:[%s2582_s22 + $0xb0] sm:$0xff] %v1376_v31 }
 0x320   : > { %v1380_v11 = vpop.f32.mrb[78].mxu0 }
 0x321   : > { %v1381_v14 = vadd.f32 %v2579_v27, %v1380_v11  ;;  %v1382_v33 = vpop.f32.mrb[79].mxu0 }
 0x323   : > { %1447 = vst [vmem:[%s2582_s22 + $0xb8] sm:$0xff] %v1381_v14 }
 0x324   : > { %v1385_v34 = vpop.f32.mrb[80].mxu0 }
 0x325   : > { %v1386_v37 = vadd.f32 %v2579_v27, %v1385_v34  ;;  %v1387_v41 = vpop.f32.mrb[81].mxu0 }
 0x327   : > { %1448 = vst [vmem:[%s2582_s22 + $0xc0] sm:$0xff] %v1386_v37 }
 0x328   : > { %v1390_v42 = vpop.f32.mrb[82].mxu0 }
 0x329   : > { %v1391_v45 = vadd.f32 %v2579_v27, %v1390_v42  ;;  %v1392_v46 = vpop.f32.mrb[83].mxu0 }
 0x32b   : > { %1449 = vst [vmem:[%s2582_s22 + $0xc8] sm:$0xff] %v1391_v45 }
 0x32c   : > { %v1395_v48 = vpop.f32.mrb[84].mxu0 }
 0x32d   : > { %v1396_v50 = vadd.f32 %v2579_v27, %v1395_v48  ;;  %v1397_v53 = vpop.f32.mrb[85].mxu0 }
 0x32f   : > { %1450 = vst [vmem:[%s2582_s22 + $0xd0] sm:$0xff] %v1396_v50 }
 0x330   : > { %v1400_v54 = vpop.f32.mrb[86].mxu0 }
 0x331   : > { %v1401_v22 = vadd.f32 %v2579_v27, %v1400_v54  ;;  %v1402_v55 = vpop.f32.mrb[87].mxu0 }
 0x333   : > { %1451 = vst [vmem:[%s2582_s22 + $0xd8] sm:$0xff] %v1401_v22 }
 0x334   : > { %v1405_v56 = vpop.f32.mrb[88].mxu0 }
 0x335   : > { %v1406_v58 = vadd.f32 %v2579_v27, %v1405_v56  ;;  %v1407_v15 = vpop.f32.mrb[89].mxu0 }
 0x337   : > { %1452 = vst [vmem:[%s2582_s22 + $0xe0] sm:$0xff] %v1406_v58 }
 0x338   : > { %v1410_v61 = vpop.f32.mrb[90].mxu0 }
 0x339   : > { %v1411_v16 = vadd.f32 %v2579_v27, %v1410_v61  ;;  %v1412_v1 = vpop.f32.mrb[91].mxu0 }
 0x33b   : > { %1453 = vst [vmem:[%s2582_s22 + $0xe8] sm:$0xff] %v1411_v16 }
 0x33c   : > { %v1415_v30 = vpop.f32.mrb[92].mxu0 }
 0x33d   : > { %v1416_v0 = vadd.f32 %v2579_v27, %v1415_v30  ;;  %v1417_v39 = vpop.f32.mrb[93].mxu0 }
 0x33f   : > { %1454 = vst [vmem:[%s2582_s22 + $0xf0] sm:$0xff] %v1416_v0 }
 0x340   : > { %v1420_v21 = vpop.f32.mrb[94].mxu0 }
 0x341   : > { %v1421_v52 = vadd.f32 %v2579_v27, %v1420_v21  ;;  %v1422_v36 = vpop.f32.mrb[95].mxu0 }
 0x343   : > { %1455 = vst [vmem:[%s2582_s22 + $0xf8] sm:$0xff] %v1421_v52 }
 0x344   : > { %1809 = shalt.err (!%p1806_p7)
}
 0x345   : > { %s1810_s19 = scalar_lea.hbm %s2650_s14, 4096  ;;  %s1814_s21 = scalar_lea.hbm %s2706_s7, 8192 }
 0x346   : > { %p1811_p8 = scmp.ne.s32.totalorder %s2650_s14, %s1810_s19  ;;  %p1815_p1 = scmp.lt.u32.totalorder %s2650_s14, %s2706_s7 }
 0x347   : > { %p1816_p0 = scmp.lt.u32.totalorder %s1814_s21, %s1810_s19  ;;  %p1818_p6 = scmp.lt.u32.totalorder %s1810_s19, %s2650_s14 }
 0x348   : > { %p1812_p11 = pnand %p1811_p8, %p2717_p9 }
 0x349   : > { %p1817_p5 = por %p1816_p0, %p1815_p1 }
 0x34a   : > { %p1813_p13 = pneg %p1812_p11 }
 0x34b   : > { %p1819_p10 = por %p1818_p6, %p1817_p5 }
 0x34d   : > { %p1820_p12 = pnand %p1819_p10, %p1813_p13 }
 0x34f   : > { %1823 = shalt.err (!%p1820_p12)
}
 0x350   : > { %s1870_s8 = smov 128   ;;  %s1871_s9 = smov 8  }
 0x351   : > { %1716 = dma.vmem_to_hbm [thread:$0]  (%p2717_p9), %s2652_s29, 4096, %s2650_s14, %s2658_s17, %s1870_s8, %s1870_s8, %s1871_s9  }
 0x352 PF: > { %p1728_p2 = scmp.ge.s32.totalorder %s1862_s27, 2  ;;  %s1485_s28 = sand.u32 1, %s1850_s24  }
 0x353   : > { %p2718_p3 = scmp.ne.s32.totalorder %s2711_s12, 0  ;;  %s1486_s18 = scalar_lea.sflag [#allocation4], %s1485_s28 }
 0x355   : > { %p1723_p4 = pnand %p1728_p2, %p2718_p3 }
 0x357   : > { %1845 = dma.done.wait (!%p1723_p4), %s1486_s18, 4096  }
 0x358   : > { %1847 = vsyncadd (!%p1723_p4), %s1486_s18, 4294963200  ;;  %p18_p7 = scmp.ge.s32.totalorder %s1937_s30, 4   ;;  %s2719_s24 = smov %s1854_s25 }
 0x359   : > { %s2720_s25 = smov %s1858_s26  ;;  %s2721_s26 = smov %s1948_s10 }
 0x35a   : > { %s2722_s27 = smov %s1937_s30  ;;  %20 = sbr.rel (!%p18_p7) target bundleno = 4 (0x4), region = 88 }
 0x361   :  { %1491 = vsyncpa [#allocation3], 1 }
 0x362   :  { %1493 = vsyncpa [#allocation3 + $0x1], 1 }
 0x363   :  { %1494 = vsyncpa [#allocation4], 1 }
 0x364   :  { %1496 = vsyncpa [#allocation4 + $0x1], 1 }

</bundles_post_ra>
